<compile_context>
chip_gen: v6e
topology: v6e:2x2x1
jax: 0.10.0
libtpu: 0.0.40
codegen_flags: <defaults>
</compile_context>

<pallas_src>
import functools
import math

import jax
import jax.numpy as jnp
from jax.experimental import pallas as pl
from jax.experimental.pallas import tpu as pltpu

LANE = 128
SUBLANE = 8


def _round_up(x, m):
    return ((x + m - 1) // m) * m


# ----------------------------------------------------------------------------
# Parameter packing: many tiny tensors -> one lane-dense (R, 128) slab.
# ----------------------------------------------------------------------------
def _pack_slab(entries, dtype):
    """entries: [(name, 2-D array)] -> (slab (R, 128), {name: (row0, (h, w))})."""
    layout = {}
    rows = []
    r = 0
    for name, a in entries:
        a = jnp.asarray(a, dtype)
        h, w = a.shape
        assert w <= LANE, f"{name}: width {w} > {LANE}"
        h_pad = _round_up(h, SUBLANE)                 # 8-aligned row offsets
        a = jnp.pad(a, ((0, h_pad - h), (0, LANE - w)))
        layout[name] = (r, (h, w))
        rows.append(a)
        r += h_pad
    return jnp.concatenate(rows, axis=0), layout


def _slab(ref, layout, name):
    r, (h, w) = layout[name]
    return ref[r:r + h, :w]                           # static slice -> cheap view load


# ----------------------------------------------------------------------------
# In-kernel building blocks
# ----------------------------------------------------------------------------
def _layer_norm(h, g, b, eps=1e-5):
    mu = jnp.mean(h, axis=-1, keepdims=True)
    var = jnp.mean((h - mu) ** 2, axis=-1, keepdims=True)
    return (h - mu) * jax.lax.rsqrt(var + eps) * g + b


def _transformer(x_flat, w_ref, v_ref, w_lay, v_lay, bb, L, D):
    """x_flat: (bb*L, in_dim) -> (bb*L, out_dim). bf16 matmuls, f32 accumulation/stats."""
    bf16, f32 = jnp.bfloat16, jnp.float32
    wg = lambda n: _slab(w_ref, w_lay, n)             # bf16 matmul weights
    vg = lambda n: _slab(v_ref, v_lay, n)             # f32 biases / LN / pos

    N = bb * L
    inv_sqrt_d = 1.0 / math.sqrt(float(D))

    # Input projection + learned positional encoding (broadcast over batch in-kernel).
    h = jnp.dot(x_flat.astype(bf16), wg("w_in"), preferred_element_type=f32)
    posb = vg("posb")                                                     # (L, D)
    h = h + jnp.broadcast_to(posb[None], (bb, L, D)).reshape(N, D)

    # Single-head self attention; separate Q/K/V mats avoid intra-tile column slicing.
    hb = h.astype(bf16)
    q = jnp.dot(hb, wg("wq"), preferred_element_type=f32) + vg("bq")
    k = jnp.dot(hb, wg("wk"), preferred_element_type=f32) + vg("bk")
    v = jnp.dot(hb, wg("wv"), preferred_element_type=f32) + vg("bv")
    q3 = q.reshape(bb, L, D).astype(bf16)
    k3 = k.reshape(bb, L, D).astype(bf16)
    v3 = v.reshape(bb, L, D).astype(bf16)
    s = jnp.einsum("bqd,bkd->bqk", q3, k3, preferred_element_type=f32) * inv_sqrt_d
    s = s - jnp.max(s, axis=-1, keepdims=True)
    p = jnp.exp(s)
    p = p * pl.reciprocal(jnp.sum(p, axis=-1, keepdims=True), approx=False)
    attn = jnp.einsum("bqk,bkd->bqd", p.astype(bf16), v3,
                      preferred_element_type=f32).reshape(N, D)
    attn = jnp.dot(attn.astype(bf16), wg("wo"), preferred_element_type=f32) + vg("bo")

    h1 = _layer_norm(h + attn, vg("ln1_g"), vg("ln1_b"))

    f = jnp.dot(h1.astype(bf16), wg("w1"), preferred_element_type=f32) + vg("b1")
    f = jnp.maximum(f, 0.0)
    f = jnp.dot(f.astype(bf16), wg("w2"), preferred_element_type=f32) + vg("b2")
    h2 = _layer_norm(h1 + f, vg("ln2_g"), vg("ln2_b"))

    return jnp.dot(h2.astype(bf16), wg("w_out"), preferred_element_type=f32) + vg("b_out")


def _vector_quantize(z, cb_ref, cbt_ref, esq_ref, n_codes):
    """z: (N, E) f32 -> (z_q, idx (N,1) i32, counts (1,K_pad), sumsq (1,1)). All f32 math."""
    f32 = jnp.float32
    e = cb_ref[...]                                   # (K_pad, E)
    e_t = cbt_ref[...]                                # (E, K_pad) pre-transposed in wrapper
    e_sq = esq_ref[...]                               # (1, K_pad) precomputed in wrapper
    k_pad = e.shape[0]

    # argmin_k ||z - e_k||^2 ; the per-row ||z||^2 term is argmin-invariant and dropped.
    # TODO(synk): for K >= ~4096 stream the codebook in K-tiles with a running (min, argmin)
    # so the full (N, K_pad) distance matrix is never materialized.
    d = e_sq - 2.0 * jnp.dot(z, e_t, preferred_element_type=f32)          # (N, K_pad)
    col = jax.lax.broadcasted_iota(jnp.int32, d.shape, 1)
    d = jnp.where(col < n_codes, d, 1e30)                                 # mask padded codes
    min_d = jnp.min(d, axis=1, keepdims=True)
    idx = jnp.min(jnp.where(d == min_d, col, k_pad), axis=1, keepdims=True)  # first argmin
    onehot = (col == idx).astype(f32)                                     # stays in VMEM only

    z_q = jnp.dot(onehot, e, preferred_element_type=f32)                  # exact codebook rows
    diff = z_q - z
    sumsq = jnp.sum(jnp.sum(diff * diff, axis=1, keepdims=True), axis=0, keepdims=True)
    counts = jnp.sum(onehot, axis=0, keepdims=True)                       # (1, K_pad)
    return z_q, idx, counts, sumsq


def _vqvae_kernel(x_ref, enc_w_ref, enc_v_ref, dec_w_ref, dec_v_ref,
                  cb_ref, cbt_ref, esq_ref,
                  xhat_ref, idx_ref, stats_ref,
                  *, enc_wl, enc_vl, dec_wl, dec_vl, n_codes, bb, L, D):
    z_e = _transformer(x_ref[...], enc_w_ref, enc_v_ref, enc_wl, enc_vl, bb, L, D)
    z_q, idx, counts, sumsq = _vector_quantize(z_e, cb_ref, cbt_ref, esq_ref, n_codes)
    # Straight-through estimator: forward value of z_e + sg[z_q - z_e] is z_q.
    x_hat = _transformer(z_q, dec_w_ref, dec_v_ref, dec_wl, dec_vl, bb, L, D)

    xhat_ref[...] = x_hat                             # lane-dense (blk_rows, F_pad) store
    idx_ref[...] = idx
    k_pad = counts.shape[-1]
    # Per-block VQ partials: row 0 = per-code counts, row 1 = sum((z_q-z)^2) broadcast.
    stats_ref[...] = jnp.concatenate(
        [counts, jnp.zeros((1, k_pad), jnp.float32) + sumsq], axis=0)[None]


# ----------------------------------------------------------------------------
# Wrapper
# ----------------------------------------------------------------------------
def _coder_slabs(p, L, in_pad=None, out_pad=None):
    D = p["w_in"].shape[1]
    w_in = p["w_in"]
    if in_pad is not None and w_in.shape[0] < in_pad:
        w_in = jnp.pad(w_in, ((0, in_pad - w_in.shape[0]), (0, 0)))
    w_out, b_out = p["w_out"], p["b_out"]
    if out_pad is not None and w_out.shape[1] < out_pad:
        pad = out_pad - w_out.shape[1]
        w_out = jnp.pad(w_out, ((0, 0), (0, pad)))
        b_out = jnp.pad(b_out, ((0, 0), (0, pad)))
    wqkv, bqkv = p["wqkv"], p["bqkv"]
    w_entries = [
        ("w_in", w_in),
        ("wq", wqkv[:, 0 * D:1 * D]), ("wk", wqkv[:, 1 * D:2 * D]), ("wv", wqkv[:, 2 * D:3 * D]),
        ("wo", p["wo"]), ("w1", p["w1"]), ("w2", p["w2"]), ("w_out", w_out),
    ]
    v_entries = [
        ("posb", p["pos"][:L] + p["b_in"]),           # pos sliced to L, bias folded in
        ("bq", bqkv[:, 0 * D:1 * D]), ("bk", bqkv[:, 1 * D:2 * D]), ("bv", bqkv[:, 2 * D:3 * D]),
        ("bo", p["bo"]), ("ln1_g", p["ln1_g"]), ("ln1_b", p["ln1_b"]),
        ("b1", p["b1"]), ("b2", p["b2"]), ("ln2_g", p["ln2_g"]), ("ln2_b", p["ln2_b"]),
        ("b_out", b_out),
    ]
    w_slab, w_lay = _pack_slab(w_entries, jnp.bfloat16)
    v_slab, v_lay = _pack_slab(v_entries, jnp.float32)
    return w_slab, w_lay, v_slab, v_lay


def _pick_block_batch(B, L, max_rows=512):
    """Largest divisor of B whose row block (bb*L) fits the target and is sublane-aligned."""
    cands = [bb for bb in range(1, B + 1)
             if B % bb == 0 and bb * L <= max_rows and (bb * L) % SUBLANE == 0]
    return max(cands) if cands else B


def vqvae_forward(x, params, beta, block_batch=None):
    """x: (B, L, feat_dim) float32. Returns the 6-tuple of the reference VQVAE.forward."""
    B, L, F = x.shape
    codebook = params["codebook"].astype(jnp.float32)
    K, E = codebook.shape
    D = params["enc"]["w_in"].shape[1]

    F_pad = _round_up(max(F, LANE), LANE)             # lane-dense input loads / x_hat stores
    K_pad = _round_up(K, LANE)

    if block_batch is None:
        block_batch = _pick_block_batch(B, L)
    assert B % block_batch == 0, "block_batch must divide the batch size"
    num_blocks = B // block_batch
    blk_rows = block_batch * L
    assert blk_rows % SUBLANE == 0 or num_blocks == 1, \
        "per-block row count must be sublane-aligned unless there is a single block"

    # Wrapper-side packing / padding (cheap XLA ops, fused).
    x_in = jnp.pad(x, ((0, 0), (0, 0), (0, F_pad - F))).reshape(B * L, F_pad)
    enc_w, enc_wl, enc_v, enc_vl = _coder_slabs(params["enc"], L, in_pad=F_pad)
    dec_w, dec_wl, dec_v, dec_vl = _coder_slabs(params["dec"], L, out_pad=F_pad)
    cb = jnp.pad(codebook, ((0, K_pad - K), (0, 0)))                      # (K_pad, E)
    cb_t = cb.T                                                           # (E, K_pad)
    e_sq = jnp.sum(cb * cb, axis=1)[None, :]                              # (1, K_pad)

    inputs = (x_in, enc_w, enc_v, dec_w, dec_v, cb, cb_t, e_sq)

    def const(shape):
        return pl.BlockSpec(shape, lambda i: (0,) * len(shape))           # weights: DMA once

    in_specs = [
        pl.BlockSpec((blk_rows, F_pad), lambda i: (i, 0)),                # x, double-buffered
        const(enc_w.shape), const(enc_v.shape), const(dec_w.shape), const(dec_v.shape),
        const(cb.shape), const(cb_t.shape), const(e_sq.shape),
    ]
    out_shapes = (
        jax.ShapeDtypeStruct((B * L, F_pad), jnp.float32),                # x_hat (lane-padded)
        jax.ShapeDtypeStruct((B * L, 1), jnp.int32),                      # min_encoding_indices
        jax.ShapeDtypeStruct((num_blocks, 2, K_pad), jnp.float32),        # per-block VQ partials
    )
    out_specs = (
        pl.BlockSpec((blk_rows, F_pad), lambda i: (i, 0)),
        pl.BlockSpec((blk_rows, 1), lambda i: (i, 0)),
        pl.BlockSpec((1, 2, K_pad), lambda i: (i, 0, 0)),
    )

    kernel = functools.partial(
        _vqvae_kernel, enc_wl=enc_wl, enc_vl=enc_vl, dec_wl=dec_wl, dec_vl=dec_vl,
        n_codes=K, bb=block_batch, L=L, D=D)

    xhat_pad, idx, stats = pl.pallas_call(
        kernel,
        grid=(num_blocks,),
        in_specs=in_specs,
        out_specs=out_specs,
        out_shape=out_shapes,
        compiler_params=pltpu.CompilerParams(
            dimension_semantics=("parallel",)),       # megacore-shardable batch axis (v7x)
    )(*inputs)

    # Finalize per-block partials outside the kernel.
    n = B * L
    counts = jnp.sum(stats[:, 0, :K], axis=0)
    e_mean = counts / n
    perplexity = jnp.exp(-jnp.sum(e_mean * jnp.log(e_mean + 1e-10)))
    sumsq = jnp.sum(stats[:, 1, 0])
    # Forward value of mean((sg[zq]-z)^2) + beta*mean((zq-sg[z])^2) == (1+beta)*mean((zq-z)^2).
    embedding_loss = (1.0 + beta) * sumsq / (n * E)

    x_hat = xhat_pad[:, :F].reshape(B, L, F)
    min_encodings = jax.nn.one_hot(idx[:, 0], K, dtype=jnp.float32)       # rebuilt from idx
    return embedding_loss, x_hat, perplexity, min_encodings, idx, codebook


# ----------------------------------------------------------------------------
# Parameter init
# ----------------------------------------------------------------------------
def init_transformer_params(key, in_dim, d_model, out_dim, max_len, ff_mult=4):
    D = d_model
    Dff = ff_mult * D
    ks = jax.random.split(key, 7)

    def lin(k, fan_in, shape):
        return jax.random.normal(k, shape, jnp.float32) * (1.0 / math.sqrt(fan_in))

    return {
        "w_in": lin(ks[0], in_dim, (in_dim, D)),
        "b_in": jnp.zeros((1, D), jnp.float32),
        "pos": jax.random.normal(ks[1], (max_len, D), jnp.float32) * 0.02,
        "wqkv": lin(ks[2], D, (D, 3 * D)),
        "bqkv": jnp.zeros((1, 3 * D), jnp.float32),
        "wo": lin(ks[3], D, (D, D)),
        "bo": jnp.zeros((1, D), jnp.float32),
        "ln1_g": jnp.ones((1, D), jnp.float32),
        "ln1_b": jnp.zeros((1, D), jnp.float32),
        "w1": lin(ks[4], D, (D, Dff)),
        "b1": jnp.zeros((1, Dff), jnp.float32),
        "w2": lin(ks[5], Dff, (Dff, D)),
        "b2": jnp.zeros((1, D), jnp.float32),
        "ln2_g": jnp.ones((1, D), jnp.float32),
        "ln2_b": jnp.zeros((1, D), jnp.float32),
        "w_out": lin(ks[6], D, (D, out_dim)),
        "b_out": jnp.zeros((1, out_dim), jnp.float32),
    }


def init_vqvae_params(key, feat_dim, max_len, n_embeddings, embedding_dim, d_model=32):
    k_enc, k_dec, k_cb = jax.random.split(key, 3)
    return {
        "enc": init_transformer_params(k_enc, feat_dim, d_model, embedding_dim, max_len),
        "dec": init_transformer_params(k_dec, embedding_dim, d_model, feat_dim, max_len),
        # codebook init: uniform(-1/K, 1/K) like the reference VectorQuantizer.
        "codebook": jax.random.uniform(
            k_cb, (n_embeddings, embedding_dim), jnp.float32,
            minval=-1.0 / n_embeddings, maxval=1.0 / n_embeddings),
    }


# ----------------------------------------------------------------------------
if __name__ == "__main__":
    feat_dim = 4
    max_len = 8          # sequence length L
    n_embeddings = 64
    embedding_dim = 32
    beta = 0.25
    batch = 2

    key = jax.random.PRNGKey(0)
    k_params, k_x = jax.random.split(key)
    params = init_vqvae_params(k_params, feat_dim, max_len, n_embeddings, embedding_dim)
    x = jax.random.normal(k_x, (batch, max_len, feat_dim), jnp.float32)   # (B, L, F)

    # Two-block grid run (exercises pipelined grid + per-block partial reduction).
    fwd = jax.jit(functools.partial(vqvae_forward, beta=beta, block_batch=1))
    outs = jax.block_until_ready(fwd(x, params))
    embedding_loss, x_hat, perplexity, min_encodings, min_idx, emb_w = outs

    # Single-block run must agree with the blocked run (grid split is semantics-free).
    fwd1 = jax.jit(functools.partial(vqvae_forward, beta=beta, block_batch=batch))
    outs1 = jax.block_until_ready(fwd1(x, params))

    assert x_hat.shape == (batch, max_len, feat_dim)
    assert min_encodings.shape == (batch * max_len, n_embeddings)
    assert min_idx.shape == (batch * max_len, 1)
    assert emb_w.shape == (n_embeddings, embedding_dim)
    assert bool(jnp.isfinite(embedding_loss)) and bool(jnp.isfinite(perplexity))
    assert bool(jnp.all(jnp.sum(min_encodings, axis=1) == 1.0))   # rows are exactly one-hot
    assert bool(jnp.all((min_idx >= 0) & (min_idx < n_embeddings)))
    for a, b in zip(outs, outs1):
        assert bool(jnp.allclose(a, b, rtol=1e-5, atol=1e-5))

    print("KERNEL_OK")
</pallas_src>

<mosaic_0001>
module attributes {stable_mosaic.version = 11 : i64} {
  func.func @_vqvae_kernel(%arg0: i32, %arg1: memref<8x128xf32, #tpu.memory_space<vmem>>, %arg2: memref<448x128xbf16, #tpu.memory_space<vmem>>, %arg3: memref<96x128xf32, #tpu.memory_space<vmem>>, %arg4: memref<352x128xbf16, #tpu.memory_space<vmem>>, %arg5: memref<96x128xf32, #tpu.memory_space<vmem>>, %arg6: memref<128x32xf32, #tpu.memory_space<vmem>>, %arg7: memref<32x128xf32, #tpu.memory_space<vmem>>, %arg8: memref<1x128xf32, #tpu.memory_space<vmem>>, %arg9: memref<8x128xf32, #tpu.memory_space<vmem>>, %arg10: memref<8x1xi32, #tpu.memory_space<vmem>>, %arg11: memref<1x2x128xf32, #tpu.memory_space<vmem>>) attributes {dimension_semantics = [#tpu.dimension_semantics<parallel>], iteration_bounds = array<i64: 2>, scalar_prefetch = 0 : i64, scratch_operands = 0 : i64, tpu.core_type = #tpu.core_type<tc>, window_params = [{transform_indices = @transform_0, window_bounds = array<i64: 8, 128>}, {pipeline_mode = #tpu.pipeline_mode<synchronous>, transform_indices = @transform_1, window_bounds = array<i64: 448, 128>}, {pipeline_mode = #tpu.pipeline_mode<synchronous>, transform_indices = @transform_2, window_bounds = array<i64: 96, 128>}, {pipeline_mode = #tpu.pipeline_mode<synchronous>, transform_indices = @transform_3, window_bounds = array<i64: 352, 128>}, {pipeline_mode = #tpu.pipeline_mode<synchronous>, transform_indices = @transform_4, window_bounds = array<i64: 96, 128>}, {pipeline_mode = #tpu.pipeline_mode<synchronous>, transform_indices = @transform_5, window_bounds = array<i64: 128, 32>}, {pipeline_mode = #tpu.pipeline_mode<synchronous>, transform_indices = @transform_6, window_bounds = array<i64: 32, 128>}, {pipeline_mode = #tpu.pipeline_mode<synchronous>, transform_indices = @transform_7, window_bounds = array<i64: 1, 128>}, {transform_indices = @transform_8, window_bounds = array<i64: 8, 128>}, {transform_indices = @transform_9, window_bounds = array<i64: 8, 1>}, {transform_indices = @transform_10, window_bounds = array<i64: 1, 2, 128>}]} {
    %c0 = arith.constant 0 : index
    %c0_0 = arith.constant 0 : index
    %0 = vector.load %arg1[%c0, %c0_0] : memref<8x128xf32, #tpu.memory_space<vmem>>, vector<8x128xf32>
    %1 = arith.truncf %0 : vector<8x128xf32> to vector<8x128xbf16>
    %c0_1 = arith.constant 0 : index
    %c0_2 = arith.constant 0 : index
    %2 = vector.load %arg2[%c0_1, %c0_2] : memref<448x128xbf16, #tpu.memory_space<vmem>>, vector<128x32xbf16>
    %cst = arith.constant dense<0.000000e+00> : vector<8x32xf32>
    %3 = tpu.matmul %1, %2, %cst {dimension_numbers = #tpu.dot_dimension_numbers<[1], [0], [0], [1], [0, 0, 1, 1], [], []>} : vector<8x128xbf16>, vector<128x32xbf16>, vector<8x32xf32> -> vector<8x32xf32>
    %c0_3 = arith.constant 0 : index
    %c0_4 = arith.constant 0 : index
    %4 = vector.load %arg3[%c0_3, %c0_4] : memref<96x128xf32, #tpu.memory_space<vmem>>, vector<8x32xf32>
    %5 = vector.shape_cast %4 : vector<8x32xf32> to vector<1x8x32xf32>
    %6 = vector.shape_cast %5 : vector<1x8x32xf32> to vector<8x32xf32>
    %7 = arith.addf %3, %6 : vector<8x32xf32>
    %8 = arith.truncf %7 : vector<8x32xf32> to vector<8x32xbf16>
    %c128 = arith.constant 128 : index
    %c0_5 = arith.constant 0 : index
    %9 = vector.load %arg2[%c128, %c0_5] : memref<448x128xbf16, #tpu.memory_space<vmem>>, vector<32x32xbf16>
    %cst_6 = arith.constant dense<0.000000e+00> : vector<8x32xf32>
    %10 = tpu.matmul %8, %9, %cst_6 {dimension_numbers = #tpu.dot_dimension_numbers<[1], [0], [0], [1], [0, 0, 1, 1], [], []>} : vector<8x32xbf16>, vector<32x32xbf16>, vector<8x32xf32> -> vector<8x32xf32>
    %c8 = arith.constant 8 : index
    %c0_7 = arith.constant 0 : index
    %11 = vector.load %arg3[%c8, %c0_7] : memref<96x128xf32, #tpu.memory_space<vmem>>, vector<1x32xf32>
    %12 = vector.broadcast %11 : vector<1x32xf32> to vector<8x32xf32>
    %13 = arith.addf %10, %12 : vector<8x32xf32>
    %c160 = arith.constant 160 : index
    %c0_8 = arith.constant 0 : index
    %14 = vector.load %arg2[%c160, %c0_8] : memref<448x128xbf16, #tpu.memory_space<vmem>>, vector<32x32xbf16>
    %cst_9 = arith.constant dense<0.000000e+00> : vector<8x32xf32>
    %15 = tpu.matmul %8, %14, %cst_9 {dimension_numbers = #tpu.dot_dimension_numbers<[1], [0], [0], [1], [0, 0, 1, 1], [], []>} : vector<8x32xbf16>, vector<32x32xbf16>, vector<8x32xf32> -> vector<8x32xf32>
    %c16 = arith.constant 16 : index
    %c0_10 = arith.constant 0 : index
    %16 = vector.load %arg3[%c16, %c0_10] : memref<96x128xf32, #tpu.memory_space<vmem>>, vector<1x32xf32>
    %17 = vector.broadcast %16 : vector<1x32xf32> to vector<8x32xf32>
    %18 = arith.addf %15, %17 : vector<8x32xf32>
    %c192 = arith.constant 192 : index
    %c0_11 = arith.constant 0 : index
    %19 = vector.load %arg2[%c192, %c0_11] : memref<448x128xbf16, #tpu.memory_space<vmem>>, vector<32x32xbf16>
    %cst_12 = arith.constant dense<0.000000e+00> : vector<8x32xf32>
    %20 = tpu.matmul %8, %19, %cst_12 {dimension_numbers = #tpu.dot_dimension_numbers<[1], [0], [0], [1], [0, 0, 1, 1], [], []>} : vector<8x32xbf16>, vector<32x32xbf16>, vector<8x32xf32> -> vector<8x32xf32>
    %c24 = arith.constant 24 : index
    %c0_13 = arith.constant 0 : index
    %21 = vector.load %arg3[%c24, %c0_13] : memref<96x128xf32, #tpu.memory_space<vmem>>, vector<1x32xf32>
    %22 = vector.broadcast %21 : vector<1x32xf32> to vector<8x32xf32>
    %23 = arith.addf %20, %22 : vector<8x32xf32>
    %24 = vector.shape_cast %13 : vector<8x32xf32> to vector<1x8x32xf32>
    %25 = arith.truncf %24 : vector<1x8x32xf32> to vector<1x8x32xbf16>
    %26 = vector.shape_cast %18 : vector<8x32xf32> to vector<1x8x32xf32>
    %27 = arith.truncf %26 : vector<1x8x32xf32> to vector<1x8x32xbf16>
    %28 = vector.shape_cast %23 : vector<8x32xf32> to vector<1x8x32xf32>
    %29 = arith.truncf %28 : vector<1x8x32xf32> to vector<1x8x32xbf16>
    "tpu.trace_start"() <{level = 10 : i32, message = "bqd,bkd->bqk"}> : () -> ()
    %cst_14 = arith.constant dense<0.000000e+00> : vector<1x8x8xf32>
    %30 = tpu.matmul %25, %27, %cst_14 {dimension_numbers = #tpu.dot_dimension_numbers<[2], [2], [1], [1], [0, 0, 0, 1, 1, 1], [0], [0]>} : vector<1x8x32xbf16>, vector<1x8x32xbf16>, vector<1x8x8xf32> -> vector<1x8x8xf32>
    "tpu.trace_stop"() : () -> ()
    %cst_15 = arith.constant 0.176776692 : f32
    %31 = vector.broadcast %cst_15 : f32 to vector<1x8x8xf32>
    %32 = arith.mulf %30, %31 : vector<1x8x8xf32>
    %cst_16 = arith.constant dense<0xFF800000> : vector<1x8xf32>
    %33 = vector.multi_reduction <maximumf>, %32, %cst_16 [2] : vector<1x8x8xf32> to vector<1x8xf32>
    %34 = vector.shape_cast %33 : vector<1x8xf32> to vector<1x8x1xf32>
    %35 = vector.broadcast %34 : vector<1x8x1xf32> to vector<1x8x8xf32>
    %36 = arith.subf %32, %35 : vector<1x8x8xf32>
    %37 = math.exp %36 : vector<1x8x8xf32>
    %cst_17 = arith.constant dense<0.000000e+00> : vector<1x8xf32>
    %38 = vector.multi_reduction <add>, %37, %cst_17 [2] : vector<1x8x8xf32> to vector<1x8xf32>
    %39 = vector.shape_cast %38 : vector<1x8xf32> to vector<1x8x1xf32>
    %40 = tpu.reciprocal %39 : vector<1x8x1xf32> -> vector<1x8x1xf32>
    %41 = vector.broadcast %40 : vector<1x8x1xf32> to vector<1x8x8xf32>
    %42 = arith.mulf %37, %41 : vector<1x8x8xf32>
    %43 = arith.truncf %42 : vector<1x8x8xf32> to vector<1x8x8xbf16>
    "tpu.trace_start"() <{level = 10 : i32, message = "bqk,bkd->bqd"}> : () -> ()
    %cst_18 = arith.constant dense<0.000000e+00> : vector<1x8x32xf32>
    %44 = tpu.matmul %43, %29, %cst_18 {dimension_numbers = #tpu.dot_dimension_numbers<[2], [1], [1], [2], [0, 0, 0, 1, 1, 2], [0], [0]>} : vector<1x8x8xbf16>, vector<1x8x32xbf16>, vector<1x8x32xf32> -> vector<1x8x32xf32>
    "tpu.trace_stop"() : () -> ()
    %45 = vector.shape_cast %44 : vector<1x8x32xf32> to vector<8x32xf32>
    %46 = arith.truncf %45 : vector<8x32xf32> to vector<8x32xbf16>
    %c224 = arith.constant 224 : index
    %c0_19 = arith.constant 0 : index
    %47 = vector.load %arg2[%c224, %c0_19] : memref<448x128xbf16, #tpu.memory_space<vmem>>, vector<32x32xbf16>
    %cst_20 = arith.constant dense<0.000000e+00> : vector<8x32xf32>
    %48 = tpu.matmul %46, %47, %cst_20 {dimension_numbers = #tpu.dot_dimension_numbers<[1], [0], [0], [1], [0, 0, 1, 1], [], []>} : vector<8x32xbf16>, vector<32x32xbf16>, vector<8x32xf32> -> vector<8x32xf32>
    %c32 = arith.constant 32 : index
    %c0_21 = arith.constant 0 : index
    %49 = vector.load %arg3[%c32, %c0_21] : memref<96x128xf32, #tpu.memory_space<vmem>>, vector<1x32xf32>
    %50 = vector.broadcast %49 : vector<1x32xf32> to vector<8x32xf32>
    %51 = arith.addf %48, %50 : vector<8x32xf32>
    %52 = arith.addf %7, %51 : vector<8x32xf32>
    %c40 = arith.constant 40 : index
    %c0_22 = arith.constant 0 : index
    %53 = vector.load %arg3[%c40, %c0_22] : memref<96x128xf32, #tpu.memory_space<vmem>>, vector<1x32xf32>
    %c48 = arith.constant 48 : index
    %c0_23 = arith.constant 0 : index
    %54 = vector.load %arg3[%c48, %c0_23] : memref<96x128xf32, #tpu.memory_space<vmem>>, vector<1x32xf32>
    %cst_24 = arith.constant dense<0.000000e+00> : vector<8xf32>
    %55 = vector.multi_reduction <add>, %52, %cst_24 [1] : vector<8x32xf32> to vector<8xf32>
    %56 = vector.shape_cast %55 : vector<8xf32> to vector<8x1xf32>
    %cst_25 = arith.constant 3.200000e+01 : f32
    %57 = vector.broadcast %cst_25 : f32 to vector<8x1xf32>
    %58 = arith.divf %56, %57 : vector<8x1xf32>
    %59 = vector.broadcast %58 : vector<8x1xf32> to vector<8x32xf32>
    %60 = arith.subf %52, %59 : vector<8x32xf32>
    %61 = arith.mulf %60, %60 : vector<8x32xf32>
    %cst_26 = arith.constant dense<0.000000e+00> : vector<8xf32>
    %62 = vector.multi_reduction <add>, %61, %cst_26 [1] : vector<8x32xf32> to vector<8xf32>
    %63 = vector.shape_cast %62 : vector<8xf32> to vector<8x1xf32>
    %cst_27 = arith.constant 3.200000e+01 : f32
    %64 = vector.broadcast %cst_27 : f32 to vector<8x1xf32>
    %65 = arith.divf %63, %64 : vector<8x1xf32>
    %66 = vector.broadcast %58 : vector<8x1xf32> to vector<8x32xf32>
    %67 = arith.subf %52, %66 : vector<8x32xf32>
    %cst_28 = arith.constant 9.99999974E-6 : f32
    %68 = vector.broadcast %cst_28 : f32 to vector<8x1xf32>
    %69 = arith.addf %65, %68 : vector<8x1xf32>
    %70 = math.rsqrt %69 : vector<8x1xf32>
    %71 = vector.broadcast %70 : vector<8x1xf32> to vector<8x32xf32>
    %72 = arith.mulf %67, %71 : vector<8x32xf32>
    %73 = vector.broadcast %53 : vector<1x32xf32> to vector<8x32xf32>
    %74 = arith.mulf %72, %73 : vector<8x32xf32>
    %75 = vector.broadcast %54 : vector<1x32xf32> to vector<8x32xf32>
    %76 = arith.addf %74, %75 : vector<8x32xf32>
    %77 = arith.truncf %76 : vector<8x32xf32> to vector<8x32xbf16>
    %c256 = arith.constant 256 : index
    %c0_29 = arith.constant 0 : index
    %78 = vector.load %arg2[%c256, %c0_29] : memref<448x128xbf16, #tpu.memory_space<vmem>>, vector<32x128xbf16>
    %cst_30 = arith.constant dense<0.000000e+00> : vector<8x128xf32>
    %79 = tpu.matmul %77, %78, %cst_30 {dimension_numbers = #tpu.dot_dimension_numbers<[1], [0], [0], [1], [0, 0, 1, 1], [], []>} : vector<8x32xbf16>, vector<32x128xbf16>, vector<8x128xf32> -> vector<8x128xf32>
    %c56 = arith.constant 56 : index
    %c0_31 = arith.constant 0 : index
    %80 = vector.load %arg3[%c56, %c0_31] : memref<96x128xf32, #tpu.memory_space<vmem>>, vector<1x128xf32>
    %81 = vector.broadcast %80 : vector<1x128xf32> to vector<8x128xf32>
    %82 = arith.addf %79, %81 : vector<8x128xf32>
    %cst_32 = arith.constant 0.000000e+00 : f32
    %83 = vector.broadcast %cst_32 : f32 to vector<8x128xf32>
    %84 = arith.maximumf %82, %83 : vector<8x128xf32>
    %85 = arith.truncf %84 : vector<8x128xf32> to vector<8x128xbf16>
    %c288 = arith.constant 288 : index
    %c0_33 = arith.constant 0 : index
    %86 = vector.load %arg2[%c288, %c0_33] : memref<448x128xbf16, #tpu.memory_space<vmem>>, vector<128x32xbf16>
    %cst_34 = arith.constant dense<0.000000e+00> : vector<8x32xf32>
    %87 = tpu.matmul %85, %86, %cst_34 {dimension_numbers = #tpu.dot_dimension_numbers<[1], [0], [0], [1], [0, 0, 1, 1], [], []>} : vector<8x128xbf16>, vector<128x32xbf16>, vector<8x32xf32> -> vector<8x32xf32>
    %c64 = arith.constant 64 : index
    %c0_35 = arith.constant 0 : index
    %88 = vector.load %arg3[%c64, %c0_35] : memref<96x128xf32, #tpu.memory_space<vmem>>, vector<1x32xf32>
    %89 = vector.broadcast %88 : vector<1x32xf32> to vector<8x32xf32>
    %90 = arith.addf %87, %89 : vector<8x32xf32>
    %91 = arith.addf %76, %90 : vector<8x32xf32>
    %c72 = arith.constant 72 : index
    %c0_36 = arith.constant 0 : index
    %92 = vector.load %arg3[%c72, %c0_36] : memref<96x128xf32, #tpu.memory_space<vmem>>, vector<1x32xf32>
    %c80 = arith.constant 80 : index
    %c0_37 = arith.constant 0 : index
    %93 = vector.load %arg3[%c80, %c0_37] : memref<96x128xf32, #tpu.memory_space<vmem>>, vector<1x32xf32>
    %cst_38 = arith.constant dense<0.000000e+00> : vector<8xf32>
    %94 = vector.multi_reduction <add>, %91, %cst_38 [1] : vector<8x32xf32> to vector<8xf32>
    %95 = vector.shape_cast %94 : vector<8xf32> to vector<8x1xf32>
    %cst_39 = arith.constant 3.200000e+01 : f32
    %96 = vector.broadcast %cst_39 : f32 to vector<8x1xf32>
    %97 = arith.divf %95, %96 : vector<8x1xf32>
    %98 = vector.broadcast %97 : vector<8x1xf32> to vector<8x32xf32>
    %99 = arith.subf %91, %98 : vector<8x32xf32>
    %100 = arith.mulf %99, %99 : vector<8x32xf32>
    %cst_40 = arith.constant dense<0.000000e+00> : vector<8xf32>
    %101 = vector.multi_reduction <add>, %100, %cst_40 [1] : vector<8x32xf32> to vector<8xf32>
    %102 = vector.shape_cast %101 : vector<8xf32> to vector<8x1xf32>
    %cst_41 = arith.constant 3.200000e+01 : f32
    %103 = vector.broadcast %cst_41 : f32 to vector<8x1xf32>
    %104 = arith.divf %102, %103 : vector<8x1xf32>
    %105 = vector.broadcast %97 : vector<8x1xf32> to vector<8x32xf32>
    %106 = arith.subf %91, %105 : vector<8x32xf32>
    %cst_42 = arith.constant 9.99999974E-6 : f32
    %107 = vector.broadcast %cst_42 : f32 to vector<8x1xf32>
    %108 = arith.addf %104, %107 : vector<8x1xf32>
    %109 = math.rsqrt %108 : vector<8x1xf32>
    %110 = vector.broadcast %109 : vector<8x1xf32> to vector<8x32xf32>
    %111 = arith.mulf %106, %110 : vector<8x32xf32>
    %112 = vector.broadcast %92 : vector<1x32xf32> to vector<8x32xf32>
    %113 = arith.mulf %111, %112 : vector<8x32xf32>
    %114 = vector.broadcast %93 : vector<1x32xf32> to vector<8x32xf32>
    %115 = arith.addf %113, %114 : vector<8x32xf32>
    %116 = arith.truncf %115 : vector<8x32xf32> to vector<8x32xbf16>
    %c416 = arith.constant 416 : index
    %c0_43 = arith.constant 0 : index
    %117 = vector.load %arg2[%c416, %c0_43] : memref<448x128xbf16, #tpu.memory_space<vmem>>, vector<32x32xbf16>
    %cst_44 = arith.constant dense<0.000000e+00> : vector<8x32xf32>
    %118 = tpu.matmul %116, %117, %cst_44 {dimension_numbers = #tpu.dot_dimension_numbers<[1], [0], [0], [1], [0, 0, 1, 1], [], []>} : vector<8x32xbf16>, vector<32x32xbf16>, vector<8x32xf32> -> vector<8x32xf32>
    %c88 = arith.constant 88 : index
    %c0_45 = arith.constant 0 : index
    %119 = vector.load %arg3[%c88, %c0_45] : memref<96x128xf32, #tpu.memory_space<vmem>>, vector<1x32xf32>
    %120 = vector.broadcast %119 : vector<1x32xf32> to vector<8x32xf32>
    %121 = arith.addf %118, %120 : vector<8x32xf32>
    %c0_46 = arith.constant 0 : index
    %c0_47 = arith.constant 0 : index
    %122 = vector.load %arg6[%c0_46, %c0_47] : memref<128x32xf32, #tpu.memory_space<vmem>>, vector<128x32xf32>
    %c0_48 = arith.constant 0 : index
    %c0_49 = arith.constant 0 : index
    %123 = vector.load %arg7[%c0_48, %c0_49] : memref<32x128xf32, #tpu.memory_space<vmem>>, vector<32x128xf32>
    %c0_50 = arith.constant 0 : index
    %c0_51 = arith.constant 0 : index
    %124 = vector.load %arg8[%c0_50, %c0_51] : memref<1x128xf32, #tpu.memory_space<vmem>>, vector<1x128xf32>
    %cst_52 = arith.constant dense<0.000000e+00> : vector<8x128xf32>
    %125 = tpu.matmul %121, %123, %cst_52 {dimension_numbers = #tpu.dot_dimension_numbers<[1], [0], [0], [1], [0, 0, 1, 1], [], []>} : vector<8x32xf32>, vector<32x128xf32>, vector<8x128xf32> -> vector<8x128xf32>
    %cst_53 = arith.constant 2.000000e+00 : f32
    %126 = vector.broadcast %cst_53 : f32 to vector<8x128xf32>
    %127 = arith.mulf %126, %125 : vector<8x128xf32>
    %128 = vector.broadcast %124 : vector<1x128xf32> to vector<8x128xf32>
    %129 = arith.subf %128, %127 : vector<8x128xf32>
    %130 = tpu.iota {dimensions = array<i32: 1>} : vector<8x128xi32>
    %c64_i32 = arith.constant 64 : i32
    %131 = vector.broadcast %c64_i32 : i32 to vector<8x128xi32>
    %132 = arith.cmpi slt, %130, %131 : vector<8x128xi32>
    %cst_54 = arith.constant 1.000000e+30 : f32
    %133 = vector.broadcast %cst_54 : f32 to vector<8x128xf32>
    %134 = arith.select %132, %129, %133 : vector<8x128xi1>, vector<8x128xf32>
    %cst_55 = arith.constant dense<0x7F800000> : vector<8xf32>
    %135 = vector.multi_reduction <minimumf>, %134, %cst_55 [1] : vector<8x128xf32> to vector<8xf32>
    %136 = vector.shape_cast %135 : vector<8xf32> to vector<8x1xf32>
    %137 = vector.broadcast %136 : vector<8x1xf32> to vector<8x128xf32>
    %138 = arith.cmpf oeq, %134, %137 : vector<8x128xf32>
    %c128_i32 = arith.constant 128 : i32
    %139 = vector.broadcast %c128_i32 : i32 to vector<8x128xi32>
    %140 = arith.select %138, %130, %139 : vector<8x128xi1>, vector<8x128xi32>
    %cst_56 = arith.constant dense<2147483647> : vector<8xi32>
    %141 = vector.multi_reduction <minsi>, %140, %cst_56 [1] : vector<8x128xi32> to vector<8xi32>
    %142 = vector.shape_cast %141 : vector<8xi32> to vector<8x1xi32>
    %143 = vector.broadcast %142 : vector<8x1xi32> to vector<8x128xi32>
    %144 = arith.cmpi eq, %130, %143 : vector<8x128xi32>
    %145 = arith.extui %144 : vector<8x128xi1> to vector<8x128xi32>
    %146 = arith.sitofp %145 : vector<8x128xi32> to vector<8x128xf32>
    %cst_57 = arith.constant dense<0.000000e+00> : vector<8x32xf32>
    %147 = tpu.matmul %146, %122, %cst_57 {dimension_numbers = #tpu.dot_dimension_numbers<[1], [0], [0], [1], [0, 0, 1, 1], [], []>} : vector<8x128xf32>, vector<128x32xf32>, vector<8x32xf32> -> vector<8x32xf32>
    %148 = arith.subf %147, %121 : vector<8x32xf32>
    %149 = arith.mulf %148, %148 : vector<8x32xf32>
    %cst_58 = arith.constant dense<0.000000e+00> : vector<8xf32>
    %150 = vector.multi_reduction <add>, %149, %cst_58 [1] : vector<8x32xf32> to vector<8xf32>
    %151 = vector.shape_cast %150 : vector<8xf32> to vector<8x1xf32>
    %cst_59 = arith.constant dense<0.000000e+00> : vector<1xf32>
    %152 = vector.multi_reduction <add>, %151, %cst_59 [0] : vector<8x1xf32> to vector<1xf32>
    %153 = vector.shape_cast %152 : vector<1xf32> to vector<1x1xf32>
    %cst_60 = arith.constant dense<0.000000e+00> : vector<128xf32>
    %154 = vector.multi_reduction <add>, %146, %cst_60 [0] : vector<8x128xf32> to vector<128xf32>
    %155 = vector.shape_cast %154 : vector<128xf32> to vector<1x128xf32>
    %156 = arith.truncf %147 : vector<8x32xf32> to vector<8x32xbf16>
    %c0_61 = arith.constant 0 : index
    %c0_62 = arith.constant 0 : index
    %157 = vector.load %arg4[%c0_61, %c0_62] : memref<352x128xbf16, #tpu.memory_space<vmem>>, vector<32x32xbf16>
    %cst_63 = arith.constant dense<0.000000e+00> : vector<8x32xf32>
    %158 = tpu.matmul %156, %157, %cst_63 {dimension_numbers = #tpu.dot_dimension_numbers<[1], [0], [0], [1], [0, 0, 1, 1], [], []>} : vector<8x32xbf16>, vector<32x32xbf16>, vector<8x32xf32> -> vector<8x32xf32>
    %c0_64 = arith.constant 0 : index
    %c0_65 = arith.constant 0 : index
    %159 = vector.load %arg5[%c0_64, %c0_65] : memref<96x128xf32, #tpu.memory_space<vmem>>, vector<8x32xf32>
    %160 = vector.shape_cast %159 : vector<8x32xf32> to vector<1x8x32xf32>
    %161 = vector.shape_cast %160 : vector<1x8x32xf32> to vector<8x32xf32>
    %162 = arith.addf %158, %161 : vector<8x32xf32>
    %163 = arith.truncf %162 : vector<8x32xf32> to vector<8x32xbf16>
    %c32_66 = arith.constant 32 : index
    %c0_67 = arith.constant 0 : index
    %164 = vector.load %arg4[%c32_66, %c0_67] : memref<352x128xbf16, #tpu.memory_space<vmem>>, vector<32x32xbf16>
    %cst_68 = arith.constant dense<0.000000e+00> : vector<8x32xf32>
    %165 = tpu.matmul %163, %164, %cst_68 {dimension_numbers = #tpu.dot_dimension_numbers<[1], [0], [0], [1], [0, 0, 1, 1], [], []>} : vector<8x32xbf16>, vector<32x32xbf16>, vector<8x32xf32> -> vector<8x32xf32>
    %c8_69 = arith.constant 8 : index
    %c0_70 = arith.constant 0 : index
    %166 = vector.load %arg5[%c8_69, %c0_70] : memref<96x128xf32, #tpu.memory_space<vmem>>, vector<1x32xf32>
    %167 = vector.broadcast %166 : vector<1x32xf32> to vector<8x32xf32>
    %168 = arith.addf %165, %167 : vector<8x32xf32>
    %c64_71 = arith.constant 64 : index
    %c0_72 = arith.constant 0 : index
    %169 = vector.load %arg4[%c64_71, %c0_72] : memref<352x128xbf16, #tpu.memory_space<vmem>>, vector<32x32xbf16>
    %cst_73 = arith.constant dense<0.000000e+00> : vector<8x32xf32>
    %170 = tpu.matmul %163, %169, %cst_73 {dimension_numbers = #tpu.dot_dimension_numbers<[1], [0], [0], [1], [0, 0, 1, 1], [], []>} : vector<8x32xbf16>, vector<32x32xbf16>, vector<8x32xf32> -> vector<8x32xf32>
    %c16_74 = arith.constant 16 : index
    %c0_75 = arith.constant 0 : index
    %171 = vector.load %arg5[%c16_74, %c0_75] : memref<96x128xf32, #tpu.memory_space<vmem>>, vector<1x32xf32>
    %172 = vector.broadcast %171 : vector<1x32xf32> to vector<8x32xf32>
    %173 = arith.addf %170, %172 : vector<8x32xf32>
    %c96 = arith.constant 96 : index
    %c0_76 = arith.constant 0 : index
    %174 = vector.load %arg4[%c96, %c0_76] : memref<352x128xbf16, #tpu.memory_space<vmem>>, vector<32x32xbf16>
    %cst_77 = arith.constant dense<0.000000e+00> : vector<8x32xf32>
    %175 = tpu.matmul %163, %174, %cst_77 {dimension_numbers = #tpu.dot_dimension_numbers<[1], [0], [0], [1], [0, 0, 1, 1], [], []>} : vector<8x32xbf16>, vector<32x32xbf16>, vector<8x32xf32> -> vector<8x32xf32>
    %c24_78 = arith.constant 24 : index
    %c0_79 = arith.constant 0 : index
    %176 = vector.load %arg5[%c24_78, %c0_79] : memref<96x128xf32, #tpu.memory_space<vmem>>, vector<1x32xf32>
    %177 = vector.broadcast %176 : vector<1x32xf32> to vector<8x32xf32>
    %178 = arith.addf %175, %177 : vector<8x32xf32>
    %179 = vector.shape_cast %168 : vector<8x32xf32> to vector<1x8x32xf32>
    %180 = arith.truncf %179 : vector<1x8x32xf32> to vector<1x8x32xbf16>
    %181 = vector.shape_cast %173 : vector<8x32xf32> to vector<1x8x32xf32>
    %182 = arith.truncf %181 : vector<1x8x32xf32> to vector<1x8x32xbf16>
    %183 = vector.shape_cast %178 : vector<8x32xf32> to vector<1x8x32xf32>
    %184 = arith.truncf %183 : vector<1x8x32xf32> to vector<1x8x32xbf16>
    "tpu.trace_start"() <{level = 10 : i32, message = "bqd,bkd->bqk"}> : () -> ()
    %cst_80 = arith.constant dense<0.000000e+00> : vector<1x8x8xf32>
    %185 = tpu.matmul %180, %182, %cst_80 {dimension_numbers = #tpu.dot_dimension_numbers<[2], [2], [1], [1], [0, 0, 0, 1, 1, 1], [0], [0]>} : vector<1x8x32xbf16>, vector<1x8x32xbf16>, vector<1x8x8xf32> -> vector<1x8x8xf32>
    "tpu.trace_stop"() : () -> ()
    %cst_81 = arith.constant 0.176776692 : f32
    %186 = vector.broadcast %cst_81 : f32 to vector<1x8x8xf32>
    %187 = arith.mulf %185, %186 : vector<1x8x8xf32>
    %cst_82 = arith.constant dense<0xFF800000> : vector<1x8xf32>
    %188 = vector.multi_reduction <maximumf>, %187, %cst_82 [2] : vector<1x8x8xf32> to vector<1x8xf32>
    %189 = vector.shape_cast %188 : vector<1x8xf32> to vector<1x8x1xf32>
    %190 = vector.broadcast %189 : vector<1x8x1xf32> to vector<1x8x8xf32>
    %191 = arith.subf %187, %190 : vector<1x8x8xf32>
    %192 = math.exp %191 : vector<1x8x8xf32>
    %cst_83 = arith.constant dense<0.000000e+00> : vector<1x8xf32>
    %193 = vector.multi_reduction <add>, %192, %cst_83 [2] : vector<1x8x8xf32> to vector<1x8xf32>
    %194 = vector.shape_cast %193 : vector<1x8xf32> to vector<1x8x1xf32>
    %195 = tpu.reciprocal %194 : vector<1x8x1xf32> -> vector<1x8x1xf32>
    %196 = vector.broadcast %195 : vector<1x8x1xf32> to vector<1x8x8xf32>
    %197 = arith.mulf %192, %196 : vector<1x8x8xf32>
    %198 = arith.truncf %197 : vector<1x8x8xf32> to vector<1x8x8xbf16>
    "tpu.trace_start"() <{level = 10 : i32, message = "bqk,bkd->bqd"}> : () -> ()
    %cst_84 = arith.constant dense<0.000000e+00> : vector<1x8x32xf32>
    %199 = tpu.matmul %198, %184, %cst_84 {dimension_numbers = #tpu.dot_dimension_numbers<[2], [1], [1], [2], [0, 0, 0, 1, 1, 2], [0], [0]>} : vector<1x8x8xbf16>, vector<1x8x32xbf16>, vector<1x8x32xf32> -> vector<1x8x32xf32>
    "tpu.trace_stop"() : () -> ()
    %200 = vector.shape_cast %199 : vector<1x8x32xf32> to vector<8x32xf32>
    %201 = arith.truncf %200 : vector<8x32xf32> to vector<8x32xbf16>
    %c128_85 = arith.constant 128 : index
    %c0_86 = arith.constant 0 : index
    %202 = vector.load %arg4[%c128_85, %c0_86] : memref<352x128xbf16, #tpu.memory_space<vmem>>, vector<32x32xbf16>
    %cst_87 = arith.constant dense<0.000000e+00> : vector<8x32xf32>
    %203 = tpu.matmul %201, %202, %cst_87 {dimension_numbers = #tpu.dot_dimension_numbers<[1], [0], [0], [1], [0, 0, 1, 1], [], []>} : vector<8x32xbf16>, vector<32x32xbf16>, vector<8x32xf32> -> vector<8x32xf32>
    %c32_88 = arith.constant 32 : index
    %c0_89 = arith.constant 0 : index
    %204 = vector.load %arg5[%c32_88, %c0_89] : memref<96x128xf32, #tpu.memory_space<vmem>>, vector<1x32xf32>
    %205 = vector.broadcast %204 : vector<1x32xf32> to vector<8x32xf32>
    %206 = arith.addf %203, %205 : vector<8x32xf32>
    %207 = arith.addf %162, %206 : vector<8x32xf32>
    %c40_90 = arith.constant 40 : index
    %c0_91 = arith.constant 0 : index
    %208 = vector.load %arg5[%c40_90, %c0_91] : memref<96x128xf32, #tpu.memory_space<vmem>>, vector<1x32xf32>
    %c48_92 = arith.constant 48 : index
    %c0_93 = arith.constant 0 : index
    %209 = vector.load %arg5[%c48_92, %c0_93] : memref<96x128xf32, #tpu.memory_space<vmem>>, vector<1x32xf32>
    %cst_94 = arith.constant dense<0.000000e+00> : vector<8xf32>
    %210 = vector.multi_reduction <add>, %207, %cst_94 [1] : vector<8x32xf32> to vector<8xf32>
    %211 = vector.shape_cast %210 : vector<8xf32> to vector<8x1xf32>
    %cst_95 = arith.constant 3.200000e+01 : f32
    %212 = vector.broadcast %cst_95 : f32 to vector<8x1xf32>
    %213 = arith.divf %211, %212 : vector<8x1xf32>
    %214 = vector.broadcast %213 : vector<8x1xf32> to vector<8x32xf32>
    %215 = arith.subf %207, %214 : vector<8x32xf32>
    %216 = arith.mulf %215, %215 : vector<8x32xf32>
    %cst_96 = arith.constant dense<0.000000e+00> : vector<8xf32>
    %217 = vector.multi_reduction <add>, %216, %cst_96 [1] : vector<8x32xf32> to vector<8xf32>
    %218 = vector.shape_cast %217 : vector<8xf32> to vector<8x1xf32>
    %cst_97 = arith.constant 3.200000e+01 : f32
    %219 = vector.broadcast %cst_97 : f32 to vector<8x1xf32>
    %220 = arith.divf %218, %219 : vector<8x1xf32>
    %221 = vector.broadcast %213 : vector<8x1xf32> to vector<8x32xf32>
    %222 = arith.subf %207, %221 : vector<8x32xf32>
    %cst_98 = arith.constant 9.99999974E-6 : f32
    %223 = vector.broadcast %cst_98 : f32 to vector<8x1xf32>
    %224 = arith.addf %220, %223 : vector<8x1xf32>
    %225 = math.rsqrt %224 : vector<8x1xf32>
    %226 = vector.broadcast %225 : vector<8x1xf32> to vector<8x32xf32>
    %227 = arith.mulf %222, %226 : vector<8x32xf32>
    %228 = vector.broadcast %208 : vector<1x32xf32> to vector<8x32xf32>
    %229 = arith.mulf %227, %228 : vector<8x32xf32>
    %230 = vector.broadcast %209 : vector<1x32xf32> to vector<8x32xf32>
    %231 = arith.addf %229, %230 : vector<8x32xf32>
    %232 = arith.truncf %231 : vector<8x32xf32> to vector<8x32xbf16>
    %c160_99 = arith.constant 160 : index
    %c0_100 = arith.constant 0 : index
    %233 = vector.load %arg4[%c160_99, %c0_100] : memref<352x128xbf16, #tpu.memory_space<vmem>>, vector<32x128xbf16>
    %cst_101 = arith.constant dense<0.000000e+00> : vector<8x128xf32>
    %234 = tpu.matmul %232, %233, %cst_101 {dimension_numbers = #tpu.dot_dimension_numbers<[1], [0], [0], [1], [0, 0, 1, 1], [], []>} : vector<8x32xbf16>, vector<32x128xbf16>, vector<8x128xf32> -> vector<8x128xf32>
    %c56_102 = arith.constant 56 : index
    %c0_103 = arith.constant 0 : index
    %235 = vector.load %arg5[%c56_102, %c0_103] : memref<96x128xf32, #tpu.memory_space<vmem>>, vector<1x128xf32>
    %236 = vector.broadcast %235 : vector<1x128xf32> to vector<8x128xf32>
    %237 = arith.addf %234, %236 : vector<8x128xf32>
    %cst_104 = arith.constant 0.000000e+00 : f32
    %238 = vector.broadcast %cst_104 : f32 to vector<8x128xf32>
    %239 = arith.maximumf %237, %238 : vector<8x128xf32>
    %240 = arith.truncf %239 : vector<8x128xf32> to vector<8x128xbf16>
    %c192_105 = arith.constant 192 : index
    %c0_106 = arith.constant 0 : index
    %241 = vector.load %arg4[%c192_105, %c0_106] : memref<352x128xbf16, #tpu.memory_space<vmem>>, vector<128x32xbf16>
    %cst_107 = arith.constant dense<0.000000e+00> : vector<8x32xf32>
    %242 = tpu.matmul %240, %241, %cst_107 {dimension_numbers = #tpu.dot_dimension_numbers<[1], [0], [0], [1], [0, 0, 1, 1], [], []>} : vector<8x128xbf16>, vector<128x32xbf16>, vector<8x32xf32> -> vector<8x32xf32>
    %c64_108 = arith.constant 64 : index
    %c0_109 = arith.constant 0 : index
    %243 = vector.load %arg5[%c64_108, %c0_109] : memref<96x128xf32, #tpu.memory_space<vmem>>, vector<1x32xf32>
    %244 = vector.broadcast %243 : vector<1x32xf32> to vector<8x32xf32>
    %245 = arith.addf %242, %244 : vector<8x32xf32>
    %246 = arith.addf %231, %245 : vector<8x32xf32>
    %c72_110 = arith.constant 72 : index
    %c0_111 = arith.constant 0 : index
    %247 = vector.load %arg5[%c72_110, %c0_111] : memref<96x128xf32, #tpu.memory_space<vmem>>, vector<1x32xf32>
    %c80_112 = arith.constant 80 : index
    %c0_113 = arith.constant 0 : index
    %248 = vector.load %arg5[%c80_112, %c0_113] : memref<96x128xf32, #tpu.memory_space<vmem>>, vector<1x32xf32>
    %cst_114 = arith.constant dense<0.000000e+00> : vector<8xf32>
    %249 = vector.multi_reduction <add>, %246, %cst_114 [1] : vector<8x32xf32> to vector<8xf32>
    %250 = vector.shape_cast %249 : vector<8xf32> to vector<8x1xf32>
    %cst_115 = arith.constant 3.200000e+01 : f32
    %251 = vector.broadcast %cst_115 : f32 to vector<8x1xf32>
    %252 = arith.divf %250, %251 : vector<8x1xf32>
    %253 = vector.broadcast %252 : vector<8x1xf32> to vector<8x32xf32>
    %254 = arith.subf %246, %253 : vector<8x32xf32>
    %255 = arith.mulf %254, %254 : vector<8x32xf32>
    %cst_116 = arith.constant dense<0.000000e+00> : vector<8xf32>
    %256 = vector.multi_reduction <add>, %255, %cst_116 [1] : vector<8x32xf32> to vector<8xf32>
    %257 = vector.shape_cast %256 : vector<8xf32> to vector<8x1xf32>
    %cst_117 = arith.constant 3.200000e+01 : f32
    %258 = vector.broadcast %cst_117 : f32 to vector<8x1xf32>
    %259 = arith.divf %257, %258 : vector<8x1xf32>
    %260 = vector.broadcast %252 : vector<8x1xf32> to vector<8x32xf32>
    %261 = arith.subf %246, %260 : vector<8x32xf32>
    %cst_118 = arith.constant 9.99999974E-6 : f32
    %262 = vector.broadcast %cst_118 : f32 to vector<8x1xf32>
    %263 = arith.addf %259, %262 : vector<8x1xf32>
    %264 = math.rsqrt %263 : vector<8x1xf32>
    %265 = vector.broadcast %264 : vector<8x1xf32> to vector<8x32xf32>
    %266 = arith.mulf %261, %265 : vector<8x32xf32>
    %267 = vector.broadcast %247 : vector<1x32xf32> to vector<8x32xf32>
    %268 = arith.mulf %266, %267 : vector<8x32xf32>
    %269 = vector.broadcast %248 : vector<1x32xf32> to vector<8x32xf32>
    %270 = arith.addf %268, %269 : vector<8x32xf32>
    %271 = arith.truncf %270 : vector<8x32xf32> to vector<8x32xbf16>
    %c320 = arith.constant 320 : index
    %c0_119 = arith.constant 0 : index
    %272 = vector.load %arg4[%c320, %c0_119] : memref<352x128xbf16, #tpu.memory_space<vmem>>, vector<32x128xbf16>
    %cst_120 = arith.constant dense<0.000000e+00> : vector<8x128xf32>
    %273 = tpu.matmul %271, %272, %cst_120 {dimension_numbers = #tpu.dot_dimension_numbers<[1], [0], [0], [1], [0, 0, 1, 1], [], []>} : vector<8x32xbf16>, vector<32x128xbf16>, vector<8x128xf32> -> vector<8x128xf32>
    %c88_121 = arith.constant 88 : index
    %c0_122 = arith.constant 0 : index
    %274 = vector.load %arg5[%c88_121, %c0_122] : memref<96x128xf32, #tpu.memory_space<vmem>>, vector<1x128xf32>
    %275 = vector.broadcast %274 : vector<1x128xf32> to vector<8x128xf32>
    %276 = arith.addf %273, %275 : vector<8x128xf32>
    %c0_123 = arith.constant 0 : index
    %c0_124 = arith.constant 0 : index
    %277 = vector.load %arg9[%c0_123, %c0_124] : memref<8x128xf32, #tpu.memory_space<vmem>>, vector<8x128xf32>
    tpu.vector_store %arg9[%c0_123, %c0_124], %276 {strides = array<i32>} : memref<8x128xf32, #tpu.memory_space<vmem>>, vector<8x128xf32>,
    %c0_125 = arith.constant 0 : index
    %c0_126 = arith.constant 0 : index
    %278 = vector.load %arg10[%c0_125, %c0_126] : memref<8x1xi32, #tpu.memory_space<vmem>>, vector<8x1xi32>
    tpu.vector_store %arg10[%c0_125, %c0_126], %142 {strides = array<i32>} : memref<8x1xi32, #tpu.memory_space<vmem>>, vector<8x1xi32>,
    %cst_127 = arith.constant 0.000000e+00 : f32
    %279 = vector.broadcast %cst_127 : f32 to vector<1x128xf32>
    %280 = vector.broadcast %153 : vector<1x1xf32> to vector<1x128xf32>
    %281 = arith.addf %279, %280 : vector<1x128xf32>
    %282 = tpu.concatenate %155, %281 in 0 : vector<1x128xf32>, vector<1x128xf32> -> vector<2x128xf32>
    %283 = vector.shape_cast %282 : vector<2x128xf32> to vector<1x2x128xf32>
    %c0_128 = arith.constant 0 : index
    %c0_129 = arith.constant 0 : index
    %c0_130 = arith.constant 0 : index
    %284 = vector.load %arg11[%c0_128, %c0_129, %c0_130] : memref<1x2x128xf32, #tpu.memory_space<vmem>>, vector<1x2x128xf32>
    tpu.vector_store %arg11[%c0_128, %c0_129, %c0_130], %283 {strides = array<i32>} : memref<1x2x128xf32, #tpu.memory_space<vmem>>, vector<1x2x128xf32>,
    return
  }
  func.func @transform_0(%arg0: i32) -> (i32, i32) {
    %c0_i32 = arith.constant 0 : i32
    %c0_i32_0 = arith.constant 0 : i32
    return %arg0, %c0_i32 : i32, i32
  }
  func.func @transform_1(%arg0: i32) -> (i32, i32) {
    %c0_i32 = arith.constant 0 : i32
    %c0_i32_0 = arith.constant 0 : i32
    %c0_i32_1 = arith.constant 0 : i32
    return %c0_i32, %c0_i32_0 : i32, i32
  }
  func.func @transform_2(%arg0: i32) -> (i32, i32) {
    %c0_i32 = arith.constant 0 : i32
    %c0_i32_0 = arith.constant 0 : i32
    %c0_i32_1 = arith.constant 0 : i32
    return %c0_i32, %c0_i32_0 : i32, i32
  }
  func.func @transform_3(%arg0: i32) -> (i32, i32) {
    %c0_i32 = arith.constant 0 : i32
    %c0_i32_0 = arith.constant 0 : i32
    %c0_i32_1 = arith.constant 0 : i32
    return %c0_i32, %c0_i32_0 : i32, i32
  }
  func.func @transform_4(%arg0: i32) -> (i32, i32) {
    %c0_i32 = arith.constant 0 : i32
    %c0_i32_0 = arith.constant 0 : i32
    %c0_i32_1 = arith.constant 0 : i32
    return %c0_i32, %c0_i32_0 : i32, i32
  }
  func.func @transform_5(%arg0: i32) -> (i32, i32) {
    %c0_i32 = arith.constant 0 : i32
    %c0_i32_0 = arith.constant 0 : i32
    %c0_i32_1 = arith.constant 0 : i32
    return %c0_i32, %c0_i32_0 : i32, i32
  }
  func.func @transform_6(%arg0: i32) -> (i32, i32) {
    %c0_i32 = arith.constant 0 : i32
    %c0_i32_0 = arith.constant 0 : i32
    %c0_i32_1 = arith.constant 0 : i32
    return %c0_i32, %c0_i32_0 : i32, i32
  }
  func.func @transform_7(%arg0: i32) -> (i32, i32) {
    %c0_i32 = arith.constant 0 : i32
    %c0_i32_0 = arith.constant 0 : i32
    %c0_i32_1 = arith.constant 0 : i32
    return %c0_i32, %c0_i32_0 : i32, i32
  }
  func.func @transform_8(%arg0: i32) -> (i32, i32) {
    %c0_i32 = arith.constant 0 : i32
    %c0_i32_0 = arith.constant 0 : i32
    return %arg0, %c0_i32 : i32, i32
  }
  func.func @transform_9(%arg0: i32) -> (i32, i32) {
    %c0_i32 = arith.constant 0 : i32
    %c0_i32_0 = arith.constant 0 : i32
    return %arg0, %c0_i32 : i32, i32
  }
  func.func @transform_10(%arg0: i32) -> (i32, i32, i32) {
    %c0_i32 = arith.constant 0 : i32
    %c0_i32_0 = arith.constant 0 : i32
    %c0_i32_1 = arith.constant 0 : i32
    return %arg0, %c0_i32, %c0_i32_0 : i32, i32, i32
  }
}

</mosaic_0001>

<bundles_post_ra>
// kernel: vqvae_forward.1
= control target key start
LH: loop header
LB: loop body
LE: loop exit
PB: predicated region body
PF: predicated region fallthrough
CT: control target
= control target key end

     0   :  { %s2768_s13 = smov 0   ;;  %s3273_s0 = inlined_call_operand.vmem [shape: f32[16,128], index: 0, kind: input, shape index: {}]   ;;  %s3274_s1 = inlined_call_operand.vmem [shape: bf16[448,128], index: 1, kind: input, shape index: {}]   ;;  %s3275_s2 = inlined_call_operand.vmem [shape: f32[96,128], index: 2, kind: input, shape index: {}]   ;;  %s3276_s3 = inlined_call_operand.vmem [shape: bf16[352,128], index: 3, kind: input, shape index: {}]   ;;  %s3277_s4 = inlined_call_operand.vmem [shape: f32[96,128], index: 4, kind: input, shape index: {}]   ;;  %s3278_s5 = inlined_call_operand.vmem [shape: f32[128,32], index: 5, kind: input, shape index: {}]   ;;  %s3279_s6 = inlined_call_operand.vmem [shape: f32[32,128], index: 6, kind: input, shape index: {}]   ;;  %s3280_s7 = inlined_call_operand.vmem [shape: f32[1,128], index: 7, kind: input, shape index: {}]   ;;  %s3281_s8 = inlined_call_operand.vmem [shape: f32[16,128], index: 8, kind: output, shape index: {0}]   ;;  %s3282_s9 = inlined_call_operand.vmem [shape: s32[16,1], index: 9, kind: output, shape index: {1}]   ;;  %s3283_s10 = inlined_call_operand.vmem [shape: f32[2,2,128], index: 10, kind: output, shape index: {2}]  }
   0x1 LB: > { %s2191_s14 = sadd.s32 4294967295, %s2708_s13   ;;  %p2195_p0 = scmp.ge.s32.totalorder %s2708_s13, 1  ;;  %s2708_s13 = sphi %s2768_s13, %s21_s13  }
   0x2   : > { %p316_p1 = scmp.lt.s32.totalorder %s2708_s13, 3 }
   0x4   : > { %p317_p2 = pnand %p2195_p0, %p316_p1 }
   0x5   : > { %p360_p3 = scmp.lt.s32.totalorder (!%p317_p2), %s2191_s14, 1 }
   0x6   : > { %320 = sbr.rel (%p317_p2) target bundleno = 5904 (0x1710), region = 52 }
   0xb   : > { %v2636_v0 = vld [vmem:[%s3274_s1 + $0x38] sm:$0xff]   ;;  %v2710_v1 = vmov 0.0   ;;  %v2637_v2 = vld [vmem:[%s3274_s1 + $0x30] sm:$0xff]   ;;  %vm2711_vm0 = vmmov 0   ;;  %v2638_v3 = vld [vmem:[%s3274_s1 + $0x28] sm:$0xff]   ;;  %s3285_s14 = smov (!%p360_p3, %s2191_s14), 1 }
   0xc   : > { %2391 = vmatprep.subr.bf16.mxu0 %v2710_v1  ;;  %2419 = vmatprep.subr.bf16.mxu1 %v2710_v1  ;;  %v2639_v4 = vld [vmem:[%s3274_s1 + $0x20] sm:$0xff]   ;;  %s2799_s23 = sshll.u32 %s3285_s14, 3  ;;  %v2645_v5 = vld [vmem:[%s3274_s1 + $0x58] sm:$0xff]   ;;  %v2641_v7 = vld [vmem:[%s3274_s1 + $0x10] sm:$0xff]   ;;  %vm506_vm1 = vcmask 261120   ;;  %vm738_vm2 = vcmask 1043456  }
   0xd   : > { %2392 = vmatpush3.bf16.msra.mxu0 %v2636_v0  ;;  %2407 = vmatprep.mubr.msk.bf16.mxu0 %vm2711_vm0, %v2710_v1  ;;  %v2640_v6 = vld [vmem:[%s3274_s1 + $0x18] sm:$0xff]   ;;  %v2642_v8 = vld [vmem:[%s3274_s1 + $0x8] sm:$0xff]   ;;  %s363_s16 = scalar_lea.vmem %s3273_s0, %s2799_s23  ;;  %v2643_v9 = vld [vmem:[%s3274_s1] sm:$0xff]   ;;  %vm722_vm3 = vcmask 64512   ;;  %s371_s26 = scalar_lea.vmem %s3282_s9, %s2799_s23  ;;  %vm2070_vm7 = vcmask 7168   ;;  %vm2073_vm9 = vcmask 1040384  }
   0xe   : > { %2393 = vmatprep.subr.bf16.mxu0 %v2710_v1  ;;  %2423 = vmatprep.mubr.msk.bf16.mxu1 %vm2711_vm0, %v2710_v1  ;;  %v377_v10 = vld [vmem:[%s363_s16] sm:$0xff]  ;;  %v2644_v11 = vld [vmem:[%s3274_s1 + $0x48] sm:$0xff]   ;;  %v2647_v14 = vld [vmem:[%s3274_s1 + $0x50] sm:$0xff]   ;;  %s2199_s12 = sshll.u32 %s3285_s14, 1  ;;  %s367_s30 = scalar_lea.vmem %s3281_s8, %s2799_s23 }
   0xf   : > { %2420 = vmatpush3.bf16.msra.mxu1 %v2645_v5  ;;  %v378_v12 = vpack.c.bf16 %v377_v10, %v377_v10  ;;  %v2646_v13 = vld [vmem:[%s3274_s1 + $0x40] sm:$0xff]   ;;  %v2648_v19 = vld [vmem:[%s3274_s1 + $0x68] sm:$0xff]   ;;  %v2212_v24 = vld [vmem:[%s3275_s2 + $0x10] ss:$0 sm:$0xff]  ;;  %s375_s17 = scalar_lea.vmem %s3283_s10, %s2199_s12 }
  0x10   : > { %2421 = vmatprep.subr.bf16.mxu1 %v2710_v1  ;;  %v395_v15 = vld [vmem:[%s3275_s2] sm:$0xff]  ;;  %v2208_v31 = vld [vmem:[%s3275_s2 + $0x8] ss:$0 sm:$0xff]  ;;  %v2216_v37 = vld [vmem:[%s3275_s2 + $0x18] ss:$0 sm:$0xff] }
  0x11   : > { %2394 = vmatpush3.bf16.msra.mxu0 %v2637_v2  ;;  %v2649_v23 = vld [vmem:[%s3274_s1 + $0x60] sm:$0xff]   ;;  %v2650_v58 = vld [vmem:[%s3274_s1 + $0x78] sm:$0xff]   ;;  %v2651_v63 = vld [vmem:[%s3274_s1 + $0x70] sm:$0xff]  }
  0x12   : > { %2395 = vmatprep.subr.bf16.mxu0 %v2710_v1 }
  0x13   : > { %2422 = vmatpush3.bf16.msra.mxu1 %v2647_v14 }
  0x14   : > { %2427 = vmatprep.subr.bf16.mxu1 %v2710_v1 }
  0x15   : > { %2396 = vmatpush3.bf16.msra.mxu0 %v2638_v3 }
  0x16   : > { %2397 = vmatprep.subr.bf16.mxu0 %v2710_v1 }
  0x19   : > { %2398 = vmatpush3.bf16.msra.mxu0 %v2639_v4 }
  0x1a   : > { %2399 = vmatprep.subr.bf16.mxu0 %v2710_v1 }
  0x1d   : > { %2400 = vmatpush3.bf16.msra.mxu0 %v2640_v6  ;;  %v2222_v6 = vld [vmem:[%s3275_s2 + $0x20] ss:$0 sm:$0xff] }
  0x1e   : > { %2401 = vmatprep.subr.bf16.mxu0 %v2710_v1 }
  0x21   : > { %2402 = vmatpush3.bf16.msra.mxu0 %v2641_v7 }
  0x22   : > { %2403 = vmatprep.subr.bf16.mxu0 %v2710_v1 }
  0x25   : > { %2404 = vmatpush3.bf16.msra.mxu0 %v2642_v8 }
  0x26   : > { %2405 = vmatprep.subr.bf16.mxu0 %v2710_v1 }
  0x29   : > { %2406 = vmatpush3.bf16.msra.mxu0 %v2643_v9 }
  0x2a   : > { %2411 = vmatprep.subr.bf16.mxu0 %v2710_v1 }
  0x2c   : > { %2408 = vmatmul.mubr.bf16.vlgmr.msra.gmra.mxu0 %v378_v12 }
  0x2d   : > { %2412 = vmatpush3.bf16.msra.mxu0 %v2644_v11  ;;  %2415 = vmatprep.mubr.msk.bf16.mxu0 %vm2711_vm0, %v2710_v1 }
  0x2e   : > { %2413 = vmatprep.subr.bf16.mxu0 %v2710_v1 }
  0x31   : > { %2414 = vmatpush3.bf16.msra.mxu0 %v2646_v13 }
  0x32   : > { %2441 = vmatprep.subr.bf16.mxu0 %v2710_v1 }
  0xec   : > { %v478_v16 = vpop.f32.mrf.mxu0 }
  0xed   : > { %v2844_v17 = vadd.f32 %v478_v16, %v395_v15 }
  0xee   : > { %v2409_v18 = vpop.f32.mrf.mxu0 }
  0xef   : > { %v484_v20 = vpack.c.bf16 %v2844_v17, %v2844_v17 }
  0xf0   : > { %v481_v21 = vpop.f32.mrf.mxu0 }
  0xf1   : > { %2416 = vmatmul.mubr.msk.bf16.vlgmr.msra.gmra.mxu0 %vm506_vm1, %v484_v20  ;;  %2424 = vmatmul.mubr.msk.bf16.vlgmr.msra.gmra.mxu1 %vm506_vm1, %v484_v20  ;;  %v2654_v21 = vld [vmem:[%s3274_s1 + $0xc8] sm:$0xff]  }
  0xf2   : > { %v2410_v22 = vpop.f32.mrf.mxu0  ;;  %2428 = vmatpush3.bf16.msra.mxu1 %v2648_v19  ;;  %2431 = vmatprep.mubr.msk.bf16.mxu1 %vm2711_vm0, %v2710_v1 }
  0xf3   : > { %2429 = vmatprep.subr.bf16.mxu1 %v2710_v1  ;;  %2443 = vmatprep.mubr.msk.bf16.mxu0 %vm2711_vm0, %v2710_v1  ;;  %v2655_v22 = vld [vmem:[%s3274_s1 + $0xc0] sm:$0xff]  }
  0xf6   : > { %2430 = vmatpush3.bf16.msra.mxu1 %v2649_v23  ;;  %v2656_v23 = vld [vmem:[%s3274_s1 + $0xb8] sm:$0xff]  }
  0xf7   : > { %2435 = vmatprep.subr.bf16.mxu1 %v2710_v1 }
  0xf9   : > { %2432 = vmatmul.mubr.msk.bf16.vlgmr.msra.gmra.mxu1 %vm506_vm1, %v484_v20  ;;  %v2652_v20 = vld [vmem:[%s3274_s1 + $0x88] sm:$0xff]  }
  0xfa   : > { %2437 = vmatprep.mubr.msk.bf16.mxu1 %vm2711_vm0, %v2710_v1 }
 0x1b1   : > { %v544_v25 = vpop.f32.mrf.mxu0  ;;  %v605_v26 = vpop.f32.mrf.mxu1 }
 0x1b2   : > { %v606_v27 = vadd.f32 %v2212_v24, %v605_v26  ;;  %v545_v38 = vadd.f32 %v2208_v31, %v544_v25  ;;  %v2657_v24 = vld [vmem:[%s3274_s1 + $0xb0] sm:$0xff]   ;;  %v2658_v25 = vld [vmem:[%s3274_s1 + $0xa8] sm:$0xff]   ;;  %v2659_v26 = vld [vmem:[%s3274_s1 + $0xa0] sm:$0xff]  }
 0x1b3   : > { %v2417_v28 = vpop.f32.mrf.mxu0  ;;  %v2425_v29 = vpop.f32.mrf.mxu1  ;;  %v2226_v31 = vld [vmem:[%s3275_s2 + $0x28] ss:$0 sm:$0xff] }
 0x1b4   : > { %v673_v30 = vpack.c.bf16 %v606_v27, %v606_v27  ;;  %v672_v42 = vpack.c.bf16 %v545_v38, %v545_v38  ;;  %v2661_v38 = vld [vmem:[%s3274_s1 + $0x90] sm:$0xff]  }
 0x1b5   : > { %v547_v32 = vpop.f32.mrf.mxu0  ;;  %v608_v33 = vpop.f32.mrf.mxu1 }
 0x1b6   : > { %v679_v34 = vsel %vm506_vm1, %v673_v30, 0  ;;  %v2227_v33 = vld [vmem:[%s3275_s2 + $0x30] ss:$0 sm:$0xff] }
 0x1b7   : > { %v2418_v35 = vpop.f32.mrf.mxu0  ;;  %v2426_v36 = vpop.f32.mrf.mxu1  ;;  %2436 = vmatpush3.bf16.xpose.msra.mxu1 %v679_v34 }
 0x1b8   : > { %2447 = vmatprep.subr.bf16.mxu1 %v2710_v1 }
 0x1b9   : > { %v666_v39 = vpop.f32.mrf.mxu1 }
 0x1ba   : > { %v667_v40 = vadd.f32 %v2216_v37, %v666_v39  ;;  %v2660_v37 = vld [vmem:[%s3274_s1 + $0x98] sm:$0xff]  }
 0x1bb   : > { %v2433_v41 = vpop.f32.mrf.mxu1  ;;  %v2228_v39 = vld [vmem:[%s3275_s2 + $0x38] ss:$0 sm:$0xff] }
 0x1bc   : > { %v674_v43 = vpack.c.bf16 %v667_v40, %v667_v40 }
 0x1bd   : > { %v669_v44 = vpop.f32.mrf.mxu1 }
 0x1be   : > { %v740_v45 = vsel %vm738_vm2, %v674_v43, 0  ;;  %2438 = vmatmul.mubr.msk.bf16.vlgmr.msra.gmra.mxu1 %vm506_vm1, %v672_v42 }
 0x1bf   : > { %v2434_v46 = vpop.f32.mrf.mxu1  ;;  %2442 = vmatpush3.bf16.msra.mxu0 %v740_v45  ;;  %2451 = vmatprep.mubr.msk.bf16.mxu1 %vm2711_vm0, %v2710_v1 }
 0x1c0   : > { %2455 = vmatprep.subr.bf16.mxu0 %v2710_v1  ;;  %2448 = vmatpush3.bf16.msra.mxu1 %v2650_v58 }
 0x1c1   : > { %2449 = vmatprep.subr.bf16.mxu1 %v2710_v1 }
 0x1c4   : > { %2450 = vmatpush3.bf16.msra.mxu1 %v2651_v63 }
 0x1c5   : > { %2463 = vmatprep.subr.bf16.mxu1 %v2710_v1 }
 0x27e   : > { %v715_v47 = vpop.f32.mrf.mxu1 }
 0x27f   : > { %v721_v48 = vmul.f32 0.17677669, %v715_v47  ;;  %v2232_v47 = vld [vmem:[%s3275_s2 + $0x40] ss:$0 sm:$0xff] }
 0x280   : > { %v2439_v49 = vpop.f32.mrf.mxu1 }
 0x281   : > { %v723_v50 = vsel %vm722_vm3, %v721_v48, -inf }
 0x282   : > { %724 = vmax.xlane.f32.xlu0 %v723_v50  ;;  %v718_v51 = vpop.f32.mrf.mxu1 }
 0x284   : > { %v2440_v52 = vpop.f32.mrf.mxu1 }
 0x30b   : > { %v725_v53 = vpop.xlane.xlu0 %724 }
 0x30c   : > { %v726_v54 = vsub.f32 %v721_v48, %v725_v53 }
 0x30e   : > { %v727_v55 = vmul.f32 1.442695, %v726_v54 }
 0x310   : > { %2686 = vpow2.f32 %v727_v55 }
 0x31d   : > { %v2687_v56 = vpop.eup %2686 }
 0x31e   : > { %v729_v57 = vsel %vm722_vm3, %v2687_v56, 0.0 }
 0x31f   : > { %730 = vadd.xlane.f32.xlu0 %v729_v57 }
 0x3a8   : > { %v731_v59 = vpop.xlane.xlu0 %730 }
 0x3a9   : > { %2688 = vrcp.f32 %v731_v59 }
 0x3b6   : > { %v2689_v60 = vpop.eup %2688 }
 0x3b7   : > { %v733_v61 = vmul.f32 %v2689_v60, %v2687_v56  ;;  %v2662_v60 = vld [vmem:[%s3274_s1 + $0xd8] sm:$0xff]  }
 0x3b9   : > { %v734_v62 = vpack.c.bf16 %v733_v61, %v733_v61  ;;  %v2663_v61 = vld [vmem:[%s3274_s1 + $0xd0] sm:$0xff]  }
 0x3bb   : > { %2444 = vmatmul.mubr.msk.bf16.vlgmr.msra.gmra.mxu0 %vm722_vm3, %v734_v62 }
 0x3bc   : > { %2459 = vmatprep.mubr.msk.bf16.mxu0 %vm2711_vm0, %v2710_v1  ;;  %2456 = vmatpush3.bf16.msra.mxu0 %v2652_v20  ;;  %v1243_v20 = vlaneseq }
 0x3bd   : > { %2457 = vmatprep.subr.bf16.mxu0 %v2710_v1 }
 0x47b   : > { %v776_v0 = vpop.f32.mrf.mxu0 }
 0x47c   : > { %v782_v2 = vpack.c.bf16 %v776_v0, %v776_v0 }
 0x47d   : > { %v2445_v3 = vpop.f32.mrf.mxu0 }
 0x47e   : > { %2452 = vmatmul.mubr.msk.bf16.vlgmr.msra.gmra.mxu1 %vm506_vm1, %v782_v2  ;;  %v2241_v3 = vld [vmem:[%s3275_s2 + $0x48] ss:$0 sm:$0xff] }
 0x47f   : > { %v779_v4 = vpop.f32.mrf.mxu0  ;;  %2479 = vmatprep.mubr.msk.bf16.mxu1 %vm2711_vm0, %v2710_v1  ;;  %2464 = vmatpush3.bf16.msra.mxu1 %v2654_v21 }
 0x480   : > { %2465 = vmatprep.subr.bf16.mxu1 %v2710_v1 }
 0x481   : > { %v2446_v5 = vpop.f32.mrf.mxu0 }
 0x482   : > { %v2242_v5 = vld [vmem:[%s3275_s2 + $0x50] ss:$0 sm:$0xff] }
 0x483   : > { %2466 = vmatpush3.bf16.msra.mxu1 %v2655_v22  ;;  %v2248_v22 = vld [vmem:[%s3280_s7] ss:$0 sm:$0xff] }
 0x484   : > { %2467 = vmatprep.subr.bf16.mxu1 %v2710_v1 }
 0x487   : > { %2468 = vmatpush3.bf16.msra.mxu1 %v2656_v23 }
 0x488   : > { %2469 = vmatprep.subr.bf16.mxu1 %v2710_v1 }
 0x48b   : > { %2470 = vmatpush3.bf16.msra.mxu1 %v2657_v24 }
 0x48c   : > { %2471 = vmatprep.subr.bf16.mxu1 %v2710_v1 }
 0x48f   : > { %2472 = vmatpush3.bf16.msra.mxu1 %v2658_v25 }
 0x490   : > { %2473 = vmatprep.subr.bf16.mxu1 %v2710_v1 }
 0x493   : > { %2474 = vmatpush3.bf16.msra.mxu1 %v2659_v26 }
 0x494   : > { %2475 = vmatprep.subr.bf16.mxu1 %v2710_v1 }
 0x497   : > { %2476 = vmatpush3.bf16.msra.mxu1 %v2660_v37  ;;  %v1150_v37 = vld [vmem:[%s3278_s5 + $0x48] sm:$0xff] }
 0x498   : > { %2477 = vmatprep.subr.bf16.mxu1 %v2710_v1 }
 0x49b   : > { %2478 = vmatpush3.bf16.msra.mxu1 %v2661_v38  ;;  %v1149_v38 = vld [vmem:[%s3278_s5 + $0x40] sm:$0xff] }
 0x49c   : > { %2537 = vmatprep.subr.bf16.mxu1 %v2710_v1 }
 0x53e   : > { %v841_v7 = vpop.f32.mrf.mxu1 }
 0x53f   : > { %v842_v8 = vadd.f32 %v2222_v6, %v841_v7 }
 0x540   : > { %v2453_v9 = vpop.f32.mrf.mxu1 }
 0x541   : > { %v847_v10 = vadd.f32 %v842_v8, %v2844_v17  ;;  %v2653_v17 = vld [vmem:[%s3274_s1 + $0x80] sm:$0xff]   ;;  %v1160_v9 = vld [vmem:[%s3279_s6 + $0x18] sm:$0xff] }
 0x542   : > { %v844_v11 = vpop.f32.mrf.mxu1  ;;  %2458 = vmatpush3.bf16.msra.mxu0 %v2653_v17  ;;  %v3004_v17 = vand.u32 127, %v1243_v20 }
 0x543   : > { %v850_v12 = vsel %vm506_vm1, %v847_v10, 0.0  ;;  %2483 = vmatprep.subr.bf16.mxu0 %v2710_v1  ;;  %v1158_v11 = vld [vmem:[%s3279_s6 + $0x8] sm:$0xff] }
 0x544   : > { %851 = vadd.xlane.f32.xlu1 %v850_v12  ;;  %v2454_v13 = vpop.f32.mrf.mxu1  ;;  %v1157_v12 = vld [vmem:[%s3279_s6] sm:$0xff]  ;;  %vm1245_vm4 = vcmp.lt.s32.totalorder %v3004_v17, 64 }
 0x545   : > { %v2243_v13 = vld [vmem:[%s3275_s2 + $0x58] ss:$0 sm:$0xff] }
 0x5cd   : > { %v852_v14 = vpop.xlane.xlu1 %851 }
 0x5ce   : > { %v854_v15 = vmul.f32 0.03125, %v852_v14 }
 0x5d0   : > { %v855_v16 = vsub.f32 %v847_v10, %v854_v15  ;;  %v1159_v10 = vld [vmem:[%s3279_s6 + $0x10] sm:$0xff] }
 0x5d2   : > { %v856_v18 = vmul.f32 %v855_v16, %v855_v16 }
 0x5d4   : > { %v857_v19 = vsel %vm506_vm1, %v856_v18, 0.0 }
 0x5d5   : > { %858 = vadd.xlane.f32.xlu1 %v857_v19 }
 0x65e   : > { %v859_v27 = vpop.xlane.xlu1 %858 }
 0x65f   : > { %v860_v28 = vmul.f32 0.03125, %v859_v27 }
 0x661   : > { %v861_v29 = vadd.f32 1e-05, %v860_v28 }
 0x663   : > { %2690 = vrsqrt.f32 %v861_v29 }
 0x670   : > { %v2691_v30 = vpop.eup %2690 }
 0x671   : > { %v863_v32 = vmul.f32 %v2691_v30, %v855_v16 }
 0x673   : > { %v868_v34 = vmul.f32 %v2226_v31, %v863_v32  ;;  %v1156_v31 = vld [vmem:[%s3278_s5 + $0x78] sm:$0xff]  ;;  %v1155_v32 = vld [vmem:[%s3278_s5 + $0x70] sm:$0xff] }
 0x675   : > { %v873_v35 = vadd.f32 %v2227_v33, %v868_v34  ;;  %v1154_v33 = vld [vmem:[%s3278_s5 + $0x68] sm:$0xff]  ;;  %v1153_v34 = vld [vmem:[%s3278_s5 + $0x60] sm:$0xff] }
 0x677   : > { %v874_v36 = vpack.c.bf16 %v873_v35, %v873_v35 }
 0x679   : > { %2460 = vmatmul.mubr.msk.bf16.vlgmr.msra.gmra.mxu0 %vm506_vm1, %v874_v36  ;;  %v1151_v36 = vld [vmem:[%s3278_s5 + $0x50] sm:$0xff] }
 0x67a   : > { %2487 = vmatprep.mubr.msk.bf16.mxu0 %vm2711_vm0, %v2710_v1  ;;  %2484 = vmatpush3.bf16.msra.mxu0 %v2662_v60 }
 0x67b   : > { %2485 = vmatprep.subr.bf16.mxu0 %v2710_v1 }
 0x67e   : > { %2486 = vmatpush3.bf16.msra.mxu0 %v2663_v61  ;;  %v2666_v61 = vld [vmem:[%s3276_s3 + $0x18] sm:$0xff]  }
 0x67f   : > { %2491 = vmatprep.subr.mxu0 %v2710_v1 }
 0x739   : > { %v933_v40 = vpop.f32.mrf.mxu0 }
 0x73a   : > { %v934_v41 = vadd.f32 %v2228_v39, %v933_v40  ;;  %v1148_v39 = vld [vmem:[%s3278_s5 + $0x38] sm:$0xff]  ;;  %v1147_v40 = vld [vmem:[%s3278_s5 + $0x30] sm:$0xff] }
 0x73b   : > { %v2461_v42 = vpop.f32.mrf.mxu0 }
 0x73c   : > { %v939_v43 = vmax.f32 %v934_v41, 0.0  ;;  %v1146_v41 = vld [vmem:[%s3278_s5 + $0x28] sm:$0xff]  ;;  %v1145_v42 = vld [vmem:[%s3278_s5 + $0x20] sm:$0xff] }
 0x73d   : > { %v936_v44 = vpop.f32.mrf.mxu0 }
 0x73e   : > { %v940_v45 = vpack.c.bf16 %v939_v43, %v939_v43  ;;  %v1144_v43 = vld [vmem:[%s3278_s5 + $0x18] sm:$0xff] }
 0x73f   : > { %v2462_v46 = vpop.f32.mrf.mxu0 }
 0x740   : > { %2480 = vmatmul.mubr.bf16.vlgmr.msra.gmra.mxu1 %v940_v45 }
 0x741   : > { %2541 = vmatprep.mubr.msk.bf16.mxu1 %vm2711_vm0, %v2710_v1 }
 0x800   : > { %v1044_v48 = vpop.f32.mrf.mxu1 }
 0x801   : > { %v1045_v49 = vadd.f32 %v2232_v47, %v1044_v48  ;;  %v1143_v48 = vld [vmem:[%s3278_s5 + $0x10] sm:$0xff] }
 0x802   : > { %v2481_v50 = vpop.f32.mrf.mxu1 }
 0x803   : > { %v1050_v51 = vadd.f32 %v1045_v49, %v873_v35  ;;  %v1152_v35 = vld [vmem:[%s3278_s5 + $0x58] sm:$0xff]  ;;  %v1142_v49 = vld [vmem:[%s3278_s5 + $0x8] sm:$0xff]  ;;  %v1141_v50 = vld [vmem:[%s3278_s5] sm:$0xff] }
 0x804   : > { %v1047_v52 = vpop.f32.mrf.mxu1 }
 0x805   : > { %v1053_v53 = vsel %vm506_vm1, %v1050_v51, 0.0 }
 0x806   : > { %1054 = vadd.xlane.f32.xlu0 %v1053_v53  ;;  %v2482_v54 = vpop.f32.mrf.mxu1 }
 0x88f   : > { %v1055_v55 = vpop.xlane.xlu0 %1054 }
 0x890   : > { %v1056_v56 = vmul.f32 0.03125, %v1055_v55 }
 0x892   : > { %v1057_v57 = vsub.f32 %v1050_v51, %v1056_v56  ;;  %v2664_v51 = vld [vmem:[%s3276_s3 + $0x8] sm:$0xff]  }
 0x893   : > { %2538 = vmatpush3.bf16.msra.mxu1 %v2664_v51 }
 0x894   : > { %v1058_v58 = vmul.f32 %v1057_v57, %v1057_v57  ;;  %2539 = vmatprep.subr.bf16.mxu1 %v2710_v1 }
 0x896   : > { %v1059_v59 = vsel %vm506_vm1, %v1058_v58, 0.0  ;;  %v2665_v58 = vld [vmem:[%s3276_s3] sm:$0xff]  }
 0x897   : > { %1060 = vadd.xlane.f32.xlu1 %v1059_v59  ;;  %2540 = vmatpush3.bf16.msra.mxu1 %v2665_v58  ;;  %v2667_v59 = vld [vmem:[%s3276_s3 + $0x38] sm:$0xff]  }
 0x898   : > { %2545 = vmatprep.subr.bf16.mxu1 %v2710_v1 }
 0x920   : > { %v1061_v62 = vpop.xlane.xlu1 %1060 }
 0x921   : > { %v1062_v63 = vmul.f32 0.03125, %v1061_v62 }
 0x923   : > { %v1063_v0 = vadd.f32 1e-05, %v1062_v63 }
 0x925   : > { %2692 = vrsqrt.f32 %v1063_v0  ;;  %v2668_v0 = vld [vmem:[%s3276_s3 + $0x10] sm:$0xff]  }
 0x932   : > { %v2693_v2 = vpop.eup %2692 }
 0x933   : > { %v1065_v4 = vmul.f32 %v2693_v2, %v1057_v57  ;;  %v2712_v57 = vmov 1.0   ;;  %v2669_v2 = vld [vmem:[%s3276_s3 + $0x30] sm:$0xff]  }
 0x935   : > { %v1070_v6 = vmul.f32 %v2241_v3, %v1065_v4  ;;  %v1360_v3 = vld [vmem:[%s3277_s4] sm:$0xff] }
 0x937   : > { %v1075_v7 = vadd.f32 %v2242_v5, %v1070_v6 }
 0x939   : > { %v1076_v8 = vpack.c.bf16 %v1075_v7, %v1075_v7  ;;  %v2670_v7 = vld [vmem:[%s3276_s3 + $0x28] sm:$0xff]  }
 0x93b   : > { %2488 = vmatmul.mubr.msk.bf16.vlgmr.msra.gmra.mxu0 %vm506_vm1, %v1076_v8 }
 0x93c   : > { %2492 = vmatpush3.msra.mxu0 %v1160_v9  ;;  %2499 = vmatprep.mubr.msk.f32.mxu0 %vm2711_vm0, %v2710_v1 }
 0x93d   : > { %2493 = vmatprep.subr.mxu0 %v2710_v1 }
 0x93e   : > { %2494 = vmatpush3.msra.mxu0 %v1159_v10 }
 0x93f   : > { %2495 = vmatprep.subr.mxu0 %v2710_v1 }
 0x940   : > { %2496 = vmatpush3.msra.mxu0 %v1158_v11  ;;  %v2671_v11 = vld [vmem:[%s3276_s3 + $0x20] sm:$0xff]  }
 0x941   : > { %2497 = vmatprep.subr.mxu0 %v2710_v1 }
 0x942   : > { %2498 = vmatpush3.msra.mxu0 %v1157_v12  ;;  %v2262_v12 = vld [vmem:[%s3277_s4 + $0x18] ss:$0 sm:$0xff] }
 0x943   : > { %2502 = vmatprep.subr.mxu0 %v2710_v1 }
 0x9fb   : > { %v1135_v14 = vpop.f32.mrf.mxu0 }
 0x9fc   : > { %v2998_v15 = vadd.f32 %v2243_v13, %v1135_v14 }
 0x9fd   : > { %v2489_v16 = vpop.f32.mrf.mxu0 }
 0x9fe   : > { %2500 = vmatmul.mubr.msk.f32.vlgmr.msra.gmra.mxu0 %vm506_vm1, %v2998_v15 }
 0x9ff   : > { %v1138_v18 = vpop.f32.mrf.mxu0  ;;  %2534 = vmatprep.mubr.msk.f32.mxu0 %vm2711_vm0, %v2710_v1  ;;  %2503 = vmatpush3.msra.mxu0 %v1156_v31  ;;  %v2254_v31 = vld [vmem:[%s3277_s4 + $0x8] ss:$0 sm:$0xff] }
 0xa00   : > { %2504 = vmatprep.subr.mxu0 %v2710_v1 }
 0xa01   : > { %v2490_v19 = vpop.f32.mrf.mxu0  ;;  %2505 = vmatpush3.msra.mxu0 %v1155_v32 }
 0xa02   : > { %2506 = vmatprep.subr.mxu0 %v2710_v1 }
 0xa03   : > { %2507 = vmatpush3.msra.mxu0 %v1154_v33 }
 0xa04   : > { %2508 = vmatprep.subr.mxu0 %v2710_v1 }
 0xa05   : > { %2509 = vmatpush3.msra.mxu0 %v1153_v34 }
 0xa06   : > { %2510 = vmatprep.subr.mxu0 %v2710_v1 }
 0xa07   : > { %2511 = vmatpush3.msra.mxu0 %v1152_v35 }
 0xa08   : > { %2512 = vmatprep.subr.mxu0 %v2710_v1 }
 0xa09   : > { %2513 = vmatpush3.msra.mxu0 %v1151_v36 }
 0xa0a   : > { %2514 = vmatprep.subr.mxu0 %v2710_v1 }
 0xa0b   : > { %2515 = vmatpush3.msra.mxu0 %v1150_v37 }
 0xa0c   : > { %2516 = vmatprep.subr.mxu0 %v2710_v1 }
 0xa0d   : > { %2517 = vmatpush3.msra.mxu0 %v1149_v38 }
 0xa0e   : > { %2518 = vmatprep.subr.mxu0 %v2710_v1 }
 0xa0f   : > { %2519 = vmatpush3.msra.mxu0 %v1148_v39 }
 0xa10   : > { %2520 = vmatprep.subr.mxu0 %v2710_v1 }
 0xa11   : > { %2521 = vmatpush3.msra.mxu0 %v1147_v40 }
 0xa12   : > { %2522 = vmatprep.subr.mxu0 %v2710_v1 }
 0xa13   : > { %2523 = vmatpush3.msra.mxu0 %v1146_v41 }
 0xa14   : > { %2524 = vmatprep.subr.mxu0 %v2710_v1 }
 0xa15   : > { %2525 = vmatpush3.msra.mxu0 %v1145_v42 }
 0xa16   : > { %2526 = vmatprep.subr.mxu0 %v2710_v1 }
 0xa17   : > { %2527 = vmatpush3.msra.mxu0 %v1144_v43 }
 0xa18   : > { %2528 = vmatprep.subr.mxu0 %v2710_v1 }
 0xa19   : > { %2529 = vmatpush3.msra.mxu0 %v1143_v48  ;;  %v2672_v48 = vld [vmem:[%s3276_s3 + $0x48] sm:$0xff]  }
 0xa1a   : > { %2530 = vmatprep.subr.mxu0 %v2710_v1 }
 0xa1b   : > { %2531 = vmatpush3.msra.mxu0 %v1142_v49 }
 0xa1c   : > { %2532 = vmatprep.subr.mxu0 %v2710_v1 }
 0xa1d   : > { %2533 = vmatpush3.msra.mxu0 %v1141_v50 }
 0xa1e   : > { %2561 = vmatprep.subr.bf16.mxu0 %v2710_v1 }
 0xabe   : > { %v1231_v21 = vpop.f32.mrf.mxu0 }
 0xabf   : > { %v1235_v23 = vmul.f32 2.0, %v1231_v21 }
 0xac0   : > { %v2501_v24 = vpop.f32.mrf.mxu0 }
 0xac1   : > { %v1242_v25 = vsub.f32 %v2248_v22, %v1235_v23 }
 0xac3   : > { %v1246_v26 = vsel %vm1245_vm4, %v1242_v25, 1e+30 }
 0xac4   : > { %1247 = vmin.xlane.f32.xlu0 %v1246_v26 }
 0xb4d   : > { %v1248_v27 = vpop.xlane.xlu0 %1247 }
 0xb4e   : > { %vm1249_vm5 = vcmp.eq.f32.partialorder %v1246_v26, %v1248_v27  ;;  %v2258_v26 = vld [vmem:[%s3277_s4 + $0x10] ss:$0 sm:$0xff] }
 0xb4f   : > { %v1250_v28 = vsel %vm1249_vm5, %v3004_v17, 128 }
 0xb50   : > { %v1252_v29 = vshra.s32 %v1250_v28, 16  ;;  %v1251_v44 = vand.u32 65535, %v1250_v28 }
 0xb52   : > { %v1254_v30 = vcvt.s32.f32 %v1252_v29  ;;  %v1253_v46 = vcvt.s32.f32 %v1251_v44 }
 0xb54   : > { %1255 = vmin.xlane.f32.xlu1 %v1254_v30 }
 0xbdd   : > { %v1256_v45 = vpop.xlane.xlu1 %1255 }
 0xbde   : > { %vm1257_vm6 = vcmp.eq.f32.partialorder %v1254_v30, %v1256_v45  ;;  %v1262_v52 = vcvt.f32.s32 %v1256_v45 }
 0xbdf   : > { %v1258_v47 = vsel %vm1257_vm6, %v1253_v46, inf }
 0xbe0   : > { %1259 = vmin.xlane.f32.xlu0 %v1258_v47  ;;  %v1263_v54 = vshll.u32 %v1262_v52, 16 }
 0xc69   : > { %v1260_v53 = vpop.xlane.xlu0 %1259 }
 0xc6a   : > { %v1261_v55 = vcvt.f32.s32 %v1260_v53  ;;  %v2673_v53 = vld [vmem:[%s3276_s3 + $0x40] sm:$0xff]  }
 0xc6c   : > { %v3083_v56 = vadd.s32 %v1263_v54, %v1261_v55 }
 0xc6e   : > { %vm1265_vm8 = vcmp.eq.s32.totalorder %v3004_v17, %v3083_v56  ;;  %2071 = vst.msk [vmem:[%s371_s26] sm:$0xff] %vm2070_vm7, %v3083_v56 }
 0xc6f   : > { %2535 = vmatmul.mubr.msk.f32.vlgmr.msra.gmra.mxu0 %vm1265_vm8, %v2712_v57 }
 0xc70   : > { %2565 = vmatprep.mubr.msk.bf16.mxu0 %vm2711_vm0, %v2710_v1  ;;  %2562 = vmatpush3.bf16.msra.mxu0 %v2667_v59 }
 0xc71   : > { %2563 = vmatprep.subr.bf16.mxu0 %v2710_v1 }
 0xc74   : > { %2564 = vmatpush3.bf16.msra.mxu0 %v2669_v2 }
 0xc75   : > { %2575 = vmatprep.subr.bf16.mxu0 %v2710_v1 }
 0xd2f   : > { %v3101_v60 = vpop.f32.mrf.mxu0 }
 0xd30   : > { %v1355_v62 = vpack.c.bf16 %v3101_v60, %v3101_v60 }
 0xd31   : > { %v2536_v63 = vpop.f32.mrf.mxu0 }
 0xd32   : > { %2542 = vmatmul.mubr.msk.bf16.vlgmr.msra.gmra.mxu1 %vm506_vm1, %v1355_v62 }
 0xd33   : > { %2546 = vmatpush3.bf16.msra.mxu1 %v2666_v61  ;;  %2549 = vmatprep.mubr.msk.bf16.mxu1 %vm2711_vm0, %v2710_v1  ;;  %v2268_v61 = vld [vmem:[%s3277_s4 + $0x20] ss:$0 sm:$0xff] }
 0xd34   : > { %2547 = vmatprep.subr.bf16.mxu1 %v2710_v1 }
 0xd37   : > { %2548 = vmatpush3.bf16.msra.mxu1 %v2668_v0 }
 0xd38   : > { %2553 = vmatprep.subr.bf16.mxu1 %v2710_v1 }
 0xdf2   : > { %v1410_v4 = vpop.f32.mrf.mxu1 }
 0xdf3   : > { %v3123_v5 = vadd.f32 %v1410_v4, %v1360_v3 }
 0xdf4   : > { %v2543_v6 = vpop.f32.mrf.mxu1 }
 0xdf5   : > { %v1416_v8 = vpack.c.bf16 %v3123_v5, %v3123_v5 }
 0xdf6   : > { %v1413_v9 = vpop.f32.mrf.mxu1 }
 0xdf7   : > { %2550 = vmatmul.mubr.msk.bf16.vlgmr.msra.gmra.mxu1 %vm506_vm1, %v1416_v8  ;;  %2566 = vmatmul.mubr.msk.bf16.vlgmr.msra.gmra.mxu0 %vm506_vm1, %v1416_v8 }
 0xdf8   : > { %v2544_v10 = vpop.f32.mrf.mxu1  ;;  %2554 = vmatpush3.bf16.msra.mxu1 %v2670_v7  ;;  %2557 = vmatprep.mubr.msk.bf16.mxu1 %vm2711_vm0, %v2710_v1 }
 0xdf9   : > { %2555 = vmatprep.subr.bf16.mxu1 %v2710_v1  ;;  %2577 = vmatprep.mubr.msk.bf16.mxu0 %vm2711_vm0, %v2710_v1 }
 0xdfc   : > { %2556 = vmatpush3.bf16.msra.mxu1 %v2671_v11 }
 0xdfd   : > { %2569 = vmatprep.subr.bf16.mxu1 %v2710_v1 }
 0xdff   : > { %2558 = vmatmul.mubr.msk.bf16.vlgmr.msra.gmra.mxu1 %vm506_vm1, %v1416_v8 }
 0xe00   : > { %2571 = vmatprep.mubr.msk.bf16.mxu1 %vm2711_vm0, %v2710_v1 }
 0xeb7   : > { %v1475_v13 = vpop.f32.mrf.mxu1  ;;  %v1597_v14 = vpop.f32.mrf.mxu0 }
 0xeb8   : > { %v1598_v16 = vadd.f32 %v2262_v12, %v1597_v14  ;;  %v1476_v35 = vadd.f32 %v2254_v31, %v1475_v13  ;;  %v2674_v12 = vld [vmem:[%s3276_s3 + $0x58] sm:$0xff]   ;;  %v2677_v14 = vld [vmem:[%s3276_s3 + $0x90] sm:$0xff]   ;;  %v2682_v31 = vld [vmem:[%s3276_s3 + $0x68] sm:$0xff]  }
 0xeb9   : > { %v2551_v18 = vpop.f32.mrf.mxu1  ;;  %v2567_v19 = vpop.f32.mrf.mxu0  ;;  %v2676_v13 = vld [vmem:[%s3276_s3 + $0x98] sm:$0xff]  }
 0xeba   : > { %v1605_v20 = vpack.c.bf16 %v1598_v16, %v1598_v16  ;;  %v1603_v36 = vpack.c.bf16 %v1476_v35, %v1476_v35  ;;  %v2678_v16 = vld [vmem:[%s3276_s3 + $0x88] sm:$0xff]   ;;  %v2679_v18 = vld [vmem:[%s3276_s3 + $0x80] sm:$0xff]   ;;  %v2680_v19 = vld [vmem:[%s3276_s3 + $0x78] sm:$0xff]  }
 0xebb   : > { %v1478_v21 = vpop.f32.mrf.mxu1  ;;  %v1600_v22 = vpop.f32.mrf.mxu0 }
 0xebc   : > { %v1669_v23 = vsel %vm738_vm2, %v1605_v20, 0  ;;  %v2681_v20 = vld [vmem:[%s3276_s3 + $0x70] sm:$0xff]  }
 0xebd   : > { %v2552_v24 = vpop.f32.mrf.mxu1  ;;  %v2568_v25 = vpop.f32.mrf.mxu0  ;;  %2576 = vmatpush3.bf16.msra.mxu0 %v1669_v23 }
 0xebe   : > { %2589 = vmatprep.subr.bf16.mxu0 %v2710_v1  ;;  %v2272_v25 = vld [vmem:[%s3277_s4 + $0x28] ss:$0 sm:$0xff] }
 0xebf   : > { %v1536_v27 = vpop.f32.mrf.mxu1 }
 0xec0   : > { %v1537_v28 = vadd.f32 %v2258_v26, %v1536_v27  ;;  %v2273_v27 = vld [vmem:[%s3277_s4 + $0x30] ss:$0 sm:$0xff] }
 0xec1   : > { %v2559_v29 = vpop.f32.mrf.mxu1 }
 0xec2   : > { %v1604_v30 = vpack.c.bf16 %v1537_v28, %v1537_v28 }
 0xec3   : > { %v1539_v32 = vpop.f32.mrf.mxu1 }
 0xec4   : > { %v1610_v33 = vsel %vm506_vm1, %v1604_v30, 0  ;;  %v2683_v32 = vld [vmem:[%s3276_s3 + $0x60] sm:$0xff]  }
 0xec5   : > { %v2560_v34 = vpop.f32.mrf.mxu1  ;;  %2570 = vmatpush3.bf16.xpose.msra.mxu1 %v1610_v33  ;;  %v2274_v33 = vld [vmem:[%s3277_s4 + $0x38] ss:$0 sm:$0xff] }
 0xec6   : > { %2581 = vmatprep.subr.bf16.mxu1 %v2710_v1 }
 0xecc   : > { %2572 = vmatmul.mubr.msk.bf16.vlgmr.msra.gmra.mxu1 %vm506_vm1, %v1603_v36 }
 0xecd   : > { %2585 = vmatprep.mubr.msk.bf16.mxu1 %vm2711_vm0, %v2710_v1  ;;  %2582 = vmatpush3.bf16.msra.mxu1 %v2672_v48 }
 0xece   : > { %2583 = vmatprep.subr.bf16.mxu1 %v2710_v1 }
 0xed1   : > { %2584 = vmatpush3.bf16.msra.mxu1 %v2673_v53 }
 0xed2   : > { %2597 = vmatprep.subr.bf16.mxu1 %v2710_v1 }
 0xf8c   : > { %v1646_v37 = vpop.f32.mrf.mxu1 }
 0xf8d   : > { %v1652_v38 = vmul.f32 0.17677669, %v1646_v37 }
 0xf8e   : > { %v2573_v39 = vpop.f32.mrf.mxu1 }
 0xf8f   : > { %v1653_v40 = vsel %vm722_vm3, %v1652_v38, -inf }
 0xf90   : > { %1654 = vmax.xlane.f32.xlu1 %v1653_v40  ;;  %v1649_v41 = vpop.f32.mrf.mxu1 }
 0xf91   : > { %v2278_v41 = vld [vmem:[%s3277_s4 + $0x40] ss:$0 sm:$0xff] }
 0xf92   : > { %v2574_v42 = vpop.f32.mrf.mxu1 }
0x1019   : > { %v1655_v43 = vpop.xlane.xlu1 %1654 }
0x101a   : > { %v1656_v44 = vsub.f32 %v1652_v38, %v1655_v43  ;;  %v1338_v43 = vsub.f32 %v3101_v60, %v2998_v15 }
0x101c   : > { %v1657_v45 = vmul.f32 1.442695, %v1656_v44  ;;  %v1339_v48 = vmul.f32 %v1338_v43, %v1338_v43 }
0x101e   : > { %2694 = vpow2.f32 %v1657_v45 }
0x102b   : > { %v2695_v46 = vpop.eup %2694 }
0x102c   : > { %v1659_v47 = vsel %vm722_vm3, %v2695_v46, 0.0 }
0x102d   : > { %1660 = vadd.xlane.f32.xlu0 %v1659_v47 }
0x10b6   : > { %v1661_v49 = vpop.xlane.xlu0 %1660 }
0x10b7   : > { %2696 = vrcp.f32 %v1661_v49 }
0x10c4   : > { %v2697_v50 = vpop.eup %2696 }
0x10c5   : > { %v1663_v51 = vmul.f32 %v2697_v50, %v2695_v46 }
0x10c7   : > { %v1664_v52 = vpack.c.bf16 %v1663_v51, %v1663_v51  ;;  %v1340_v51 = vsel %vm506_vm1, %v1339_v48, 0.0 }
0x10c9   : > { %2578 = vmatmul.mubr.msk.bf16.vlgmr.msra.gmra.mxu0 %vm722_vm3, %v1664_v52  ;;  %v2249_v52 = vsel %vm1265_vm8, 1.0, %v2710_v1 }
0x10ca   : > { %2593 = vmatprep.mubr.msk.bf16.mxu0 %vm2711_vm0, %v2710_v1  ;;  %2590 = vmatpush3.bf16.msra.mxu0 %v2674_v12  ;;  %v1349_v53 = vrot.slane %v2249_v52, 4 }
0x10cb   : > { %2591 = vmatprep.subr.bf16.mxu0 %v2710_v1 }
0x10cc   : > { %v1350_v15 = vadd.f32 %v2249_v52, %v1349_v53 }
0x1189   : > { %v1705_v54 = vpop.f32.mrf.mxu0 }
0x118a   : > { %v1711_v55 = vpack.c.bf16 %v1705_v54, %v1705_v54 }
0x118b   : > { %v2579_v57 = vpop.f32.mrf.mxu0 }
0x118c   : > { %2586 = vmatmul.mubr.msk.bf16.vlgmr.msra.gmra.mxu1 %vm506_vm1, %v1711_v55  ;;  %v1351_v55 = vrot.slane %v1350_v15, 2 }
0x118d   : > { %v1708_v58 = vpop.f32.mrf.mxu0  ;;  %2613 = vmatprep.mubr.msk.bf16.mxu1 %vm2711_vm0, %v2710_v1  ;;  %2598 = vmatpush3.bf16.msra.mxu1 %v2676_v13  ;;  %v2287_v13 = vld [vmem:[%s3277_s4 + $0x48] ss:$0 sm:$0xff] }
0x118e   : > { %2599 = vmatprep.subr.bf16.mxu1 %v2710_v1 }
0x118f   : > { %v2580_v59 = vpop.f32.mrf.mxu0 }
0x1191   : > { %2600 = vmatpush3.bf16.msra.mxu1 %v2677_v14 }
0x1192   : > { %2601 = vmatprep.subr.bf16.mxu1 %v2710_v1 }
0x1195   : > { %2602 = vmatpush3.bf16.msra.mxu1 %v2678_v16  ;;  %v2288_v16 = vld [vmem:[%s3277_s4 + $0x50] ss:$0 sm:$0xff] }
0x1196   : > { %2603 = vmatprep.subr.bf16.mxu1 %v2710_v1 }
0x1199   : > { %2604 = vmatpush3.bf16.msra.mxu1 %v2679_v18 }
0x119a   : > { %2605 = vmatprep.subr.bf16.mxu1 %v2710_v1 }
0x119d   : > { %2606 = vmatpush3.bf16.msra.mxu1 %v2680_v19 }
0x119e   : > { %2607 = vmatprep.subr.bf16.mxu1 %v2710_v1 }
0x11a1   : > { %2608 = vmatpush3.bf16.msra.mxu1 %v2681_v20 }
0x11a2   : > { %2609 = vmatprep.subr.bf16.mxu1 %v2710_v1 }
0x11a5   : > { %2610 = vmatpush3.bf16.msra.mxu1 %v2682_v31 }
0x11a6   : > { %2611 = vmatprep.subr.bf16.mxu1 %v2710_v1 }
0x11a9   : > { %2612 = vmatpush3.bf16.msra.mxu1 %v2683_v32 }
0x124c   : > { %v1770_v62 = vpop.f32.mrf.mxu1 }
0x124d   : > { %v1771_v63 = vadd.f32 %v2268_v61, %v1770_v62  ;;  %v1352_v62 = vadd.f32 %v1351_v55, %v1350_v15 }
0x124e   : > { %v2587_v0 = vpop.f32.mrf.mxu1 }
0x124f   : > { %v1776_v2 = vadd.f32 %v1771_v63, %v3123_v5  ;;  %v2675_v5 = vld [vmem:[%s3276_s3 + $0x50] sm:$0xff]  }
0x1250   : > { %v1773_v3 = vpop.f32.mrf.mxu1  ;;  %2592 = vmatpush3.bf16.msra.mxu0 %v2675_v5 }
0x1251   : > { %v1779_v4 = vsel %vm506_vm1, %v1776_v2, 0.0  ;;  %2617 = vmatprep.subr.bf16.mxu0 %v2710_v1  ;;  %v1353_v3 = vrot.slane %v1352_v62, 1 }
0x1252   : > { %1780 = vadd.xlane.f32.xlu1 %v1779_v4  ;;  %v2588_v6 = vpop.f32.mrf.mxu1 }
0x1253   : > { %v1354_v56 = vadd.f32 %v1353_v3, %v1352_v62 }
0x12db   : > { %v1781_v7 = vpop.xlane.xlu1 %1780 }
0x12dc   : > { %v1782_v8 = vmul.f32 0.03125, %v1781_v7 }
0x12de   : > { %v1783_v9 = vsub.f32 %v1776_v2, %v1782_v8  ;;  %v2684_v8 = vld [vmem:[%s3276_s3 + $0xa8] sm:$0xff]  }
0x12e0   : > { %v1784_v10 = vmul.f32 %v1783_v9, %v1783_v9 }
0x12e2   : > { %v1785_v11 = vsel %vm506_vm1, %v1784_v10, 0.0 }
0x12e3   : > { %1786 = vadd.xlane.f32.xlu0 %v1785_v11 }
0x136c   : > { %v1787_v21 = vpop.xlane.xlu0 %1786 }
0x136d   : > { %v1788_v22 = vmul.f32 0.03125, %v1787_v21 }
0x136f   : > { %v1789_v23 = vadd.f32 1e-05, %v1788_v22 }
0x1371   : > { %2698 = vrsqrt.f32 %v1789_v23 }
0x137e   : > { %v2699_v24 = vpop.eup %2698 }
0x137f   : > { %v1791_v26 = vmul.f32 %v2699_v24, %v1783_v9  ;;  %v2685_v9 = vld [vmem:[%s3276_s3 + $0xa0] sm:$0xff]  }
0x1381   : > { %v1796_v28 = vmul.f32 %v2272_v25, %v1791_v26 }
0x1383   : > { %v1801_v29 = vadd.f32 %v2273_v27, %v1796_v28 }
0x1385   : > { %v1802_v30 = vpack.c.bf16 %v1801_v29, %v1801_v29 }
0x1387   : > { %2594 = vmatmul.mubr.msk.bf16.vlgmr.msra.gmra.mxu0 %vm506_vm1, %v1802_v30 }
0x1388   : > { %2621 = vmatprep.mubr.msk.bf16.mxu0 %vm2711_vm0, %v2710_v1  ;;  %2618 = vmatpush3.bf16.msra.mxu0 %v2684_v8 }
0x1389   : > { %2619 = vmatprep.subr.bf16.mxu0 %v2710_v1  ;;  %v2289_v1 = vld [vmem:[%s3277_s4 + $0x58] ss:$0 sm:$0xff] }
0x138c   : > { %2620 = vmatpush3.bf16.msra.mxu0 %v2685_v9 }
0x1447   : > { %v1861_v34 = vpop.f32.mrf.mxu0 }
0x1448   : > { %v1862_v35 = vadd.f32 %v2274_v33, %v1861_v34 }
0x1449   : > { %v2595_v36 = vpop.f32.mrf.mxu0 }
0x144a   : > { %v1867_v37 = vmax.f32 %v1862_v35, 0.0 }
0x144b   : > { %v1864_v38 = vpop.f32.mrf.mxu0 }
0x144c   : > { %v1868_v39 = vpack.c.bf16 %v1867_v37, %v1867_v37 }
0x144d   : > { %v2596_v40 = vpop.f32.mrf.mxu0 }
0x144e   : > { %2614 = vmatmul.mubr.bf16.vlgmr.msra.gmra.mxu1 %v1868_v39 }
0x150e   : > { %v1972_v42 = vpop.f32.mrf.mxu1 }
0x150f   : > { %v1973_v44 = vadd.f32 %v2278_v41, %v1972_v42 }
0x1510   : > { %v2615_v45 = vpop.f32.mrf.mxu1 }
0x1511   : > { %v1978_v46 = vadd.f32 %v1973_v44, %v1801_v29 }
0x1512   : > { %v1975_v47 = vpop.f32.mrf.mxu1 }
0x1513   : > { %v1981_v49 = vsel %vm506_vm1, %v1978_v46, 0.0 }
0x1514   : > { %1982 = vadd.xlane.f32.xlu1 %v1981_v49  ;;  %v2616_v50 = vpop.f32.mrf.mxu1 }
0x1518   : > { %1341 = vadd.xlane.f32.xlu1 %v1340_v51 }
0x159d   : > { %v1983_v60 = vpop.xlane.xlu1 %1982 }
0x159e   : > { %v1984_v54 = vmul.f32 0.03125, %v1983_v60 }
0x15a0   : > { %v1985_v57 = vsub.f32 %v1978_v46, %v1984_v54 }
0x15a1   : > { %v1342_v58 = vpop.xlane.xlu1 %1341 }
0x15a2   : > { %v1343_v59 = vrot.slane %v1342_v58, 4  ;;  %v1986_v61 = vmul.f32 %v1985_v57, %v1985_v57 }
0x15a4   : > { %v1344_v63 = vadd.f32 %v1343_v59, %v1342_v58  ;;  %v1987_v0 = vsel %vm506_vm1, %v1986_v61, 0.0 }
0x15a5   : > { %1988 = vadd.xlane.f32.xlu0 %v1987_v0 }
0x15a6   : > { %v1345_v2 = vrot.slane %v1344_v63, 2 }
0x15a8   : > { %v1346_v4 = vadd.f32 %v1345_v2, %v1344_v63 }
0x15aa   : > { %v1347_v17 = vrot.slane %v1346_v4, 1 }
0x15ac   : > { %v1348_v6 = vadd.f32 %v1347_v17, %v1346_v4 }
0x15ae   : > { %v2074_v7 = vsel %vm2073_vm9, %v1354_v56, %v1348_v6 }
0x15af   : > { %2075 = vst [vmem:[%s375_s17] sm:$0x3] %v2074_v7 }
0x162e   : > { %v1989_v10 = vpop.xlane.xlu0 %1988 }
0x162f   : > { %v1990_v11 = vmul.f32 0.03125, %v1989_v10 }
0x1631   : > { %v1991_v12 = vadd.f32 1e-05, %v1990_v11 }
0x1633   : > { %2700 = vrsqrt.f32 %v1991_v12 }
0x1640   : > { %v2701_v5 = vpop.eup %2700 }
0x1641   : > { %v1993_v14 = vmul.f32 %v2701_v5, %v1985_v57 }
0x1643   : > { %v1998_v18 = vmul.f32 %v2287_v13, %v1993_v14 }
0x1645   : > { %v2003_v19 = vadd.f32 %v2288_v16, %v1998_v18 }
0x1647   : > { %v2004_v20 = vpack.c.bf16 %v2003_v19, %v2003_v19 }
0x1649   : > { %2622 = vmatmul.mubr.msk.bf16.vlgmr.msra.gmra.mxu0 %vm506_vm1, %v2004_v20 }
0x1709   : > { %v2063_v21 = vpop.f32.mrf.mxu0 }
0x170a   : > { %v2064_v22 = vadd.f32 %v2289_v1, %v2063_v21 }
0x170b   : > { %v2623_v23 = vpop.f32.mrf.mxu0 }
0x170c   : > { %2069 = vst [vmem:[%s367_s30] sm:$0xff] %v2064_v22 }
0x170d   : > { %v2066_v24 = vpop.f32.mrf.mxu0 }
0x170f   : > { %v2624_v25 = vpop.f32.mrf.mxu0 }
0x1710 PF: > { %s21_s13 = sadd.s32 1, %s2708_s13  }
0x1711   : > { %p18_p4 = scmp.ge.s32.totalorder %s21_s13, 4  }
0x1713   :  { %20 = sbr.rel (!%p18_p4) target bundleno = 1 (0x1), region = 106 }

</bundles_post_ra>
